<compile_context>
chip_gen: v7x
topology: tpu7x:2x2x1
jax: 0.10.0
libtpu: 0.0.40
codegen_flags: <defaults>
</compile_context>

<pallas_src>
import math
from functools import partial

import jax
import jax.numpy as jnp
from jax.experimental import pallas as pl
from jax.experimental.pallas import tpu as pltpu


def _round_up(x, m):
    return ((x + m - 1) // m) * m


_VMEM_LIMIT_CACHE = None


def _vmem_limit():
    """<=48 MiB on 64 MiB parts (v7x), <=96 MiB on 128 MiB parts (v5e/v6e)."""
    global _VMEM_LIMIT_CACHE
    if _VMEM_LIMIT_CACHE is None:
        cap = 64 * 1024 * 1024
        try:
            cap = int(getattr(pltpu.get_tpu_info(), "vmem_capacity_bytes", cap))
        except Exception:
            pass
        _VMEM_LIMIT_CACHE = int(min(max(cap - 16 * 1024 * 1024, 32 * 1024 * 1024),
                                    96 * 1024 * 1024))
    return _VMEM_LIMIT_CACHE


def _silu_f32(x):
    return x * jax.nn.sigmoid(x)


# ---------------- Pass A: f_e on the node axis ----------------
def _fe_kernel(e_ref, w1_ref, w2_ref, o_ref):
    # e_ref: (TN, n_orb*Ee)  w1: (n_orb*Ee, C)  w2: (C, C)  (block-diagonal)
    h = jnp.dot(e_ref[...], w1_ref[...], preferred_element_type=jnp.float32)
    h = _silu_f32(h)
    h = jnp.dot(h.astype(w2_ref.dtype), w2_ref[...], preferred_element_type=jnp.float32)
    h = _silu_f32(h)
    o_ref[...] = h.astype(o_ref.dtype)


# ---------------- Pass B: edge compute + robust BN partial stats ----------------
def _edge_stats_kernel(zcat_ref, et_ref, wz_ref, stats_ref, *, te, n_edges):
    C = stats_ref.shape[-1]
    # z_out already replicated across orbitals because wz is column-replicated.
    z_out = jnp.dot(zcat_ref[...], wz_ref[...], preferred_element_type=jnp.float32)
    coeff = et_ref[...].astype(jnp.float32) * (1.0 + z_out)       # e + e*z == e*(1+z)

    base = pl.program_id(0) * te
    row = jax.lax.broadcasted_iota(jnp.int32, (te, 1), 0) + base
    valid = row < n_edges                                          # mask padded rows
    cnt = jnp.minimum(jnp.maximum(n_edges - base, 0), te).astype(jnp.float32)

    s = jnp.sum(coeff, axis=0, keepdims=True)                      # (1, C); pads are 0
    mu = s / jnp.maximum(cnt, 1.0)                                 # per-tile mean
    d = jnp.where(valid, coeff - mu, 0.0)
    m2 = jnp.sum(d * d, axis=0, keepdims=True)                     # centered sumsq
    cnt_row = jnp.zeros((1, C), jnp.float32) + cnt
    stats_ref[...] = jnp.concatenate([s, m2, cnt_row], axis=0).reshape(1, 3, C)


# ---------------- Pass C: recompute coeff, apply BatchNorm affine ----------------
def _edge_bn_kernel(zcat_ref, et_ref, wz_ref, scale_ref, shift_ref, o_ref):
    z_out = jnp.dot(zcat_ref[...], wz_ref[...], preferred_element_type=jnp.float32)
    coeff = et_ref[...].astype(jnp.float32) * (1.0 + z_out)
    o_ref[...] = coeff * scale_ref[...] + shift_ref[...]


def embed_coeffs(z_emb, e_emb, idx_s, idx_t, params, *,
                 compute_dtype=jnp.float32, et_dtype=jnp.bfloat16,
                 node_tile=2048, edge_tile=4096):
    N, Z = z_emb.shape
    _, n_orb, Ee = e_emb.shape
    M = params["wz_s"].shape[1]
    C = n_orb * M
    E = idx_s.shape[0]
    cd, f32 = compute_dtype, jnp.float32
    cd_bytes = jnp.dtype(cd).itemsize
    et_bytes = jnp.dtype(et_dtype).itemsize
    vmem_limit = _vmem_limit()

    # ---- Pass A: f_e(e_emb) ----
    w1_bd = params["we1_bd"].astype(cd)
    w2_bd = params["we2_bd"].astype(cd)
    e_flat = e_emb.reshape(N, n_orb * Ee).astype(cd)

    tn = min(node_tile, _round_up(N, 8))
    n_pad = _round_up(N, tn)
    if n_pad != N:
        e_flat = jnp.pad(e_flat, ((0, n_pad - N), (0, 0)))

    fe_cost = pl.CostEstimate(
        flops=int(2 * n_pad * (n_orb * Ee) * C + 2 * n_pad * C * C),
        transcendentals=int(2 * n_pad * C),
        bytes_accessed=int((e_flat.size + w1_bd.size + w2_bd.size) * cd_bytes
                           + n_pad * C * et_bytes))
    efe = pl.pallas_call(
        _fe_kernel,
        out_shape=jax.ShapeDtypeStruct((n_pad, C), et_dtype),
        grid=(n_pad // tn,),
        in_specs=[pl.BlockSpec((tn, n_orb * Ee), lambda i: (i, 0)),
                  pl.BlockSpec((n_orb * Ee, C), lambda i: (0, 0)),
                  pl.BlockSpec((C, C), lambda i: (0, 0))],
        out_specs=pl.BlockSpec((tn, C), lambda i: (i, 0)),
        compiler_params=pltpu.CompilerParams(
            dimension_semantics=("parallel",), vmem_limit_bytes=vmem_limit),
        cost_estimate=fe_cost,
    )(e_flat, w1_bd, w2_bd)

    # TODO(synk): per-edge row gather has no clean BlockSpec form for multi-row
    # tiles, so idx_s/idx_t gathers stay in XLA take(); a PrefetchScalarGridSpec
    # with a VMEM-resident efe table is only worth it when E >> N and N*C fits.
    z_cat = jnp.concatenate([jnp.take(z_emb, idx_s, axis=0),
                             jnp.take(z_emb, idx_t, axis=0)], axis=-1).astype(cd)  # (E, 2Z)
    et = jnp.take(efe[:N], idx_t, axis=0)                                          # (E, C)

    # Column-replicated f_z weight -> one lane-dense (2Z, C) matmul per tile.
    wz_rep = jnp.tile(jnp.concatenate([params["wz_s"], params["wz_t"]], axis=0),
                      (1, n_orb)).astype(cd)                                        # (2Z, C)

    te = min(edge_tile, _round_up(E, 8))
    e_pad = _round_up(E, te)
    if e_pad != E:
        z_cat = jnp.pad(z_cat, ((0, e_pad - E), (0, 0)))
        et = jnp.pad(et, ((0, e_pad - E), (0, 0)))
    n_tiles = e_pad // te

    edge_read_bytes = int(z_cat.size * cd_bytes + et.size * et_bytes
                          + wz_rep.size * cd_bytes)

    # ---- Pass B: per-tile BN partials (coeff never written to HBM) ----
    stats_cost = pl.CostEstimate(
        flops=int(2 * e_pad * (2 * Z) * C + 6 * e_pad * C),
        transcendentals=0,
        bytes_accessed=edge_read_bytes + int(n_tiles * 3 * C * 4))
    partial_stats = pl.pallas_call(
        partial(_edge_stats_kernel, te=te, n_edges=E),
        out_shape=jax.ShapeDtypeStruct((n_tiles, 3, C), f32),
        grid=(n_tiles,),
        in_specs=[pl.BlockSpec((te, 2 * Z), lambda i: (i, 0)),
                  pl.BlockSpec((te, C), lambda i: (i, 0)),
                  pl.BlockSpec((2 * Z, C), lambda i: (0, 0))],
        out_specs=pl.BlockSpec((1, 3, C), lambda i: (i, 0, 0)),
        compiler_params=pltpu.CompilerParams(
            dimension_semantics=("parallel",), vmem_limit_bytes=vmem_limit),
        cost_estimate=stats_cost,
    )(z_cat, et, wz_rep)

    # ---- global BN stats: Chan combine of per-tile (sum, centered M2, count) ----
    tile_sum = partial_stats[:, 0, :]                              # (n_tiles, C)
    tile_m2 = partial_stats[:, 1, :]
    tile_cnt = partial_stats[:, 2, :]
    mean = jnp.sum(tile_sum, axis=0) / E
    tile_mu = tile_sum / jnp.maximum(tile_cnt, 1.0)
    m2_total = jnp.sum(tile_m2, axis=0) + jnp.sum(tile_cnt * jnp.square(tile_mu - mean), axis=0)
    var = m2_total / E                                             # biased (training BN)
    inv_std = jax.lax.rsqrt(var + 1e-5)
    scale = (params["gamma"] * inv_std).reshape(1, C).astype(f32)
    shift = (params["beta"] - params["gamma"] * mean * inv_std).reshape(1, C).astype(f32)

    # ---- Pass C: recompute coeff + apply BN affine ----
    bn_cost = pl.CostEstimate(
        flops=int(2 * e_pad * (2 * Z) * C + 4 * e_pad * C),
        transcendentals=0,
        bytes_accessed=edge_read_bytes + int(e_pad * C * 4))
    out_flat = pl.pallas_call(
        _edge_bn_kernel,
        out_shape=jax.ShapeDtypeStruct((e_pad, C), f32),
        grid=(n_tiles,),
        in_specs=[pl.BlockSpec((te, 2 * Z), lambda i: (i, 0)),
                  pl.BlockSpec((te, C), lambda i: (i, 0)),
                  pl.BlockSpec((2 * Z, C), lambda i: (0, 0)),
                  pl.BlockSpec((1, C), lambda i: (0, 0)),
                  pl.BlockSpec((1, C), lambda i: (0, 0))],
        out_specs=pl.BlockSpec((te, C), lambda i: (i, 0)),
        compiler_params=pltpu.CompilerParams(
            dimension_semantics=("parallel",), vmem_limit_bytes=vmem_limit),
        cost_estimate=bn_cost,
    )(z_cat, et, wz_rep, scale, shift)

    return out_flat[:E].reshape(E, n_orb, M)


def init_params(key, emb_size, emb_size_z, emb_size_e, n_orb):
    """Deterministic synthetic parameters matching EmbedCoeffs.__init__ shapes."""
    M, Z, Ee = emb_size, emb_size_z, emb_size_e
    k1, k2, k3 = jax.random.split(key, 3)
    wz = jax.random.normal(k1, (2 * Z, M), jnp.float32) / math.sqrt(2 * Z)   # f_z (no bias)
    we1 = jax.random.normal(k2, (Ee, M), jnp.float32) / math.sqrt(Ee)        # f_e dense 1
    we2 = jax.random.normal(k3, (M, M), jnp.float32) / math.sqrt(M)          # f_e dense 2
    # block-diagonal copies: fold the per-orbital Dense into one lane-dense matmul
    we1_bd = jnp.zeros((n_orb * Ee, n_orb * M), jnp.float32)
    we2_bd = jnp.zeros((n_orb * M, n_orb * M), jnp.float32)
    for o in range(n_orb):
        we1_bd = we1_bd.at[o * Ee:(o + 1) * Ee, o * M:(o + 1) * M].set(we1)
        we2_bd = we2_bd.at[o * M:(o + 1) * M, o * M:(o + 1) * M].set(we2)
    C = n_orb * M
    return {
        "wz_s": wz[:Z], "wz_t": wz[Z:],
        "we1": we1, "we2": we2,
        "we1_bd": we1_bd, "we2_bd": we2_bd,
        "gamma": jnp.ones((C,), jnp.float32),    # BatchNorm1d default affine
        "beta": jnp.zeros((C,), jnp.float32),
    }


def reference(z_emb, e_emb, idx_s, idx_t, params):
    hp = jax.lax.Precision.HIGHEST
    z_cat = jnp.concatenate([z_emb[idx_s], z_emb[idx_t]], axis=-1)
    wz = jnp.concatenate([params["wz_s"], params["wz_t"]], axis=0)
    z_out = jnp.dot(z_cat, wz, precision=hp)                       # (E, M)
    h = jax.nn.silu(jnp.einsum("noe,em->nom", e_emb, params["we1"], precision=hp))
    h = jax.nn.silu(jnp.einsum("nom,mk->nok", h, params["we2"], precision=hp))
    e_t = h[idx_t]                                                 # (E, n_orb, M)
    coeff = e_t + e_t * z_out[:, None, :]
    flat = coeff.reshape(coeff.shape[0], -1)
    mean, var = flat.mean(0), flat.var(0)                          # biased var (training BN)
    flat = (flat - mean) * jax.lax.rsqrt(var + 1e-5) * params["gamma"] + params["beta"]
    return flat.reshape(coeff.shape)


if __name__ == "__main__":
    jax.config.update("jax_default_matmul_precision", "highest")

    N, E, n_orb = 24, 40, 4
    emb_size, emb_size_z, emb_size_e = 32, 16, 16

    key = jax.random.PRNGKey(0)
    kz, ke, ks, kt, kp = jax.random.split(key, 5)
    z_emb = jax.random.normal(kz, (N, emb_size_z), jnp.float32)
    e_emb = jax.random.normal(ke, (N, n_orb, emb_size_e), jnp.float32)
    idx_s = jax.random.randint(ks, (E,), 0, N, dtype=jnp.int32)
    idx_t = jax.random.randint(kt, (E,), 0, N, dtype=jnp.int32)
    params = init_params(kp, emb_size, emb_size_z, emb_size_e, n_orb)

    fwd = jax.jit(embed_coeffs,
                  static_argnames=("compute_dtype", "et_dtype", "node_tile", "edge_tile"))

    ref = reference(z_emb, e_emb, idx_s, idx_t, params)

    # f32-stream path: checked against the pure-JAX reference.
    out_f32 = fwd(z_emb, e_emb, idx_s, idx_t, params, et_dtype=jnp.float32)
    jax.block_until_ready(out_f32)
    assert out_f32.shape == (E, n_orb, emb_size) and out_f32.dtype == jnp.float32
    err = float(jnp.abs(out_f32 - ref).max())
    assert jnp.allclose(out_f32, ref, atol=2e-2, rtol=2e-2), err

    # Default traffic-optimized path (bf16 efe/et stream, f32 accumulation).
    out = fwd(z_emb, e_emb, idx_s, idx_t, params)
    jax.block_until_ready(out)
    assert out.shape == (E, n_orb, emb_size) and out.dtype == jnp.float32
    err_bf = float(jnp.abs(out - ref).max())
    assert jnp.allclose(out, ref, atol=6e-2, rtol=6e-2), err_bf

    # bf16 compute path (weights/z stream also bf16); loosened tolerance check.
    out_bf = fwd(z_emb, e_emb, idx_s, idx_t, params, compute_dtype=jnp.bfloat16)
    jax.block_until_ready(out_bf)
    err_bc = float(jnp.abs(out_bf - ref).max())
    assert jnp.allclose(out_bf, ref, atol=1.5e-1, rtol=1.5e-1), err_bc

    print("KERNEL_OK")
</pallas_src>

<mosaic_0001>
module attributes {stable_mosaic.version = 11 : i64} {
  func.func @_fe_kernel(%arg0: i32, %arg1: memref<24x64xf32, #tpu.memory_space<vmem>>, %arg2: memref<64x128xf32, #tpu.memory_space<vmem>>, %arg3: memref<128x128xf32, #tpu.memory_space<vmem>>, %arg4: memref<24x128xf32, #tpu.memory_space<vmem>>) attributes {dimension_semantics = [#tpu.dimension_semantics<parallel>], iteration_bounds = array<i64: 1>, scalar_prefetch = 0 : i64, scratch_operands = 0 : i64, tpu.core_type = #tpu.core_type<tc>, window_params = [{transform_indices = @transform_0, window_bounds = array<i64: 24, 64>}, {pipeline_mode = #tpu.pipeline_mode<synchronous>, transform_indices = @transform_1, window_bounds = array<i64: 64, 128>}, {pipeline_mode = #tpu.pipeline_mode<synchronous>, transform_indices = @transform_2, window_bounds = array<i64: 128, 128>}, {transform_indices = @transform_3, window_bounds = array<i64: 24, 128>}]} {
    %c0 = arith.constant 0 : index
    %c0_0 = arith.constant 0 : index
    %0 = vector.load %arg1[%c0, %c0_0] : memref<24x64xf32, #tpu.memory_space<vmem>>, vector<24x64xf32>
    %c0_1 = arith.constant 0 : index
    %c0_2 = arith.constant 0 : index
    %1 = vector.load %arg2[%c0_1, %c0_2] : memref<64x128xf32, #tpu.memory_space<vmem>>, vector<64x128xf32>
    %cst = arith.constant dense<0.000000e+00> : vector<24x128xf32>
    %2 = tpu.matmul %0, %1, %cst {dimension_numbers = #tpu.dot_dimension_numbers<[1], [0], [0], [1], [0, 0, 1, 1], [], []>, precision = #tpu.contract_precision<fp32>} : vector<24x64xf32>, vector<64x128xf32>, vector<24x128xf32> -> vector<24x128xf32>
    %3 = arith.negf %2 : vector<24x128xf32>
    %4 = math.exp %3 : vector<24x128xf32>
    %cst_3 = arith.constant 1.000000e+00 : f32
    %5 = vector.broadcast %cst_3 : f32 to vector<24x128xf32>
    %6 = arith.addf %5, %4 : vector<24x128xf32>
    %7 = arith.divf %5, %6 : vector<24x128xf32>
    %8 = arith.mulf %2, %7 : vector<24x128xf32>
    %c0_4 = arith.constant 0 : index
    %c0_5 = arith.constant 0 : index
    %9 = vector.load %arg3[%c0_4, %c0_5] : memref<128x128xf32, #tpu.memory_space<vmem>>, vector<128x128xf32>
    %cst_6 = arith.constant dense<0.000000e+00> : vector<24x128xf32>
    %10 = tpu.matmul %8, %9, %cst_6 {dimension_numbers = #tpu.dot_dimension_numbers<[1], [0], [0], [1], [0, 0, 1, 1], [], []>, precision = #tpu.contract_precision<fp32>} : vector<24x128xf32>, vector<128x128xf32>, vector<24x128xf32> -> vector<24x128xf32>
    %11 = arith.negf %10 : vector<24x128xf32>
    %12 = math.exp %11 : vector<24x128xf32>
    %cst_7 = arith.constant 1.000000e+00 : f32
    %13 = vector.broadcast %cst_7 : f32 to vector<24x128xf32>
    %14 = arith.addf %13, %12 : vector<24x128xf32>
    %15 = arith.divf %13, %14 : vector<24x128xf32>
    %16 = arith.mulf %10, %15 : vector<24x128xf32>
    %c0_8 = arith.constant 0 : index
    %c0_9 = arith.constant 0 : index
    %17 = vector.load %arg4[%c0_8, %c0_9] : memref<24x128xf32, #tpu.memory_space<vmem>>, vector<24x128xf32>
    tpu.vector_store %arg4[%c0_8, %c0_9], %16 {strides = array<i32>} : memref<24x128xf32, #tpu.memory_space<vmem>>, vector<24x128xf32>,
    return
  }
  func.func @transform_0(%arg0: i32) -> (i32, i32) {
    %c0_i32 = arith.constant 0 : i32
    %c0_i32_0 = arith.constant 0 : i32
    return %arg0, %c0_i32 : i32, i32
  }
  func.func @transform_1(%arg0: i32) -> (i32, i32) {
    %c0_i32 = arith.constant 0 : i32
    %c0_i32_0 = arith.constant 0 : i32
    %c0_i32_1 = arith.constant 0 : i32
    return %c0_i32, %c0_i32_0 : i32, i32
  }
  func.func @transform_2(%arg0: i32) -> (i32, i32) {
    %c0_i32 = arith.constant 0 : i32
    %c0_i32_0 = arith.constant 0 : i32
    %c0_i32_1 = arith.constant 0 : i32
    return %c0_i32, %c0_i32_0 : i32, i32
  }
  func.func @transform_3(%arg0: i32) -> (i32, i32) {
    %c0_i32 = arith.constant 0 : i32
    %c0_i32_0 = arith.constant 0 : i32
    return %arg0, %c0_i32 : i32, i32
  }
}

module attributes {stable_mosaic.version = 11 : i64} {
  func.func @_edge_stats_kernel(%arg0: i32, %arg1: memref<40x32xf32, #tpu.memory_space<vmem>>, %arg2: memref<40x128xf32, #tpu.memory_space<vmem>>, %arg3: memref<32x128xf32, #tpu.memory_space<vmem>>, %arg4: memref<1x3x128xf32, #tpu.memory_space<vmem>>) attributes {dimension_semantics = [#tpu.dimension_semantics<parallel>], iteration_bounds = array<i64: 1>, scalar_prefetch = 0 : i64, scratch_operands = 0 : i64, tpu.core_type = #tpu.core_type<tc>, window_params = [{transform_indices = @transform_0, window_bounds = array<i64: 40, 32>}, {transform_indices = @transform_1, window_bounds = array<i64: 40, 128>}, {pipeline_mode = #tpu.pipeline_mode<synchronous>, transform_indices = @transform_2, window_bounds = array<i64: 32, 128>}, {transform_indices = @transform_3, window_bounds = array<i64: 1, 3, 128>}]} {
    %c0 = arith.constant 0 : index
    %c0_0 = arith.constant 0 : index
    %0 = vector.load %arg1[%c0, %c0_0] : memref<40x32xf32, #tpu.memory_space<vmem>>, vector<40x32xf32>
    %c0_1 = arith.constant 0 : index
    %c0_2 = arith.constant 0 : index
    %1 = vector.load %arg3[%c0_1, %c0_2] : memref<32x128xf32, #tpu.memory_space<vmem>>, vector<32x128xf32>
    %cst = arith.constant dense<0.000000e+00> : vector<40x128xf32>
    %2 = tpu.matmul %0, %1, %cst {dimension_numbers = #tpu.dot_dimension_numbers<[1], [0], [0], [1], [0, 0, 1, 1], [], []>, precision = #tpu.contract_precision<fp32>} : vector<40x32xf32>, vector<32x128xf32>, vector<40x128xf32> -> vector<40x128xf32>
    %c0_3 = arith.constant 0 : index
    %c0_4 = arith.constant 0 : index
    %3 = vector.load %arg2[%c0_3, %c0_4] : memref<40x128xf32, #tpu.memory_space<vmem>>, vector<40x128xf32>
    %cst_5 = arith.constant 1.000000e+00 : f32
    %4 = vector.broadcast %cst_5 : f32 to vector<40x128xf32>
    %5 = arith.addf %4, %2 : vector<40x128xf32>
    %6 = arith.mulf %3, %5 : vector<40x128xf32>
    %c40_i32 = arith.constant 40 : i32
    %7 = arith.muli %arg0, %c40_i32 : i32
    %8 = tpu.iota {dimensions = array<i32: 0>} : vector<40x1xi32>
    %9 = vector.broadcast %7 : i32 to vector<40x1xi32>
    %10 = arith.addi %8, %9 : vector<40x1xi32>
    %c40_i32_6 = arith.constant 40 : i32
    %11 = vector.broadcast %c40_i32_6 : i32 to vector<40x1xi32>
    %12 = arith.cmpi slt, %10, %11 : vector<40x1xi32>
    %c40_i32_7 = arith.constant 40 : i32
    %13 = arith.subi %c40_i32_7, %7 : i32
    %c0_i32 = arith.constant 0 : i32
    %14 = arith.maxsi %13, %c0_i32 : i32
    %c40_i32_8 = arith.constant 40 : i32
    %15 = arith.minsi %14, %c40_i32_8 : i32
    %16 = arith.sitofp %15 : i32 to f32
    %cst_9 = arith.constant dense<0.000000e+00> : vector<128xf32>
    %17 = vector.multi_reduction <add>, %6, %cst_9 [0] : vector<40x128xf32> to vector<128xf32>
    %18 = vector.shape_cast %17 : vector<128xf32> to vector<1x128xf32>
    %cst_10 = arith.constant 1.000000e+00 : f32
    %19 = arith.maximumf %16, %cst_10 : f32
    %20 = vector.broadcast %19 : f32 to vector<1x128xf32>
    %21 = arith.divf %18, %20 : vector<1x128xf32>
    %22 = vector.broadcast %21 : vector<1x128xf32> to vector<40x128xf32>
    %23 = arith.subf %6, %22 : vector<40x128xf32>
    %cst_11 = arith.constant 0.000000e+00 : f32
    %24 = vector.shape_cast %12 : vector<40x1xi1> to vector<40x1xi1>
    %25 = vector.broadcast %24 : vector<40x1xi1> to vector<40x128xi1>
    %26 = vector.broadcast %cst_11 : f32 to vector<40x128xf32>
    %27 = arith.select %25, %23, %26 : vector<40x128xi1>, vector<40x128xf32>
    %28 = arith.mulf %27, %27 : vector<40x128xf32>
    %cst_12 = arith.constant dense<0.000000e+00> : vector<128xf32>
    %29 = vector.multi_reduction <add>, %28, %cst_12 [0] : vector<40x128xf32> to vector<128xf32>
    %30 = vector.shape_cast %29 : vector<128xf32> to vector<1x128xf32>
    %cst_13 = arith.constant 0.000000e+00 : f32
    %31 = vector.broadcast %cst_13 : f32 to vector<1x128xf32>
    %32 = vector.broadcast %16 : f32 to vector<1x128xf32>
    %33 = arith.addf %31, %32 : vector<1x128xf32>
    %34 = tpu.concatenate %18, %30, %33 in 0 : vector<1x128xf32>, vector<1x128xf32>, vector<1x128xf32> -> vector<3x128xf32>
    %35 = vector.shape_cast %34 : vector<3x128xf32> to vector<1x3x128xf32>
    %c0_14 = arith.constant 0 : index
    %c0_15 = arith.constant 0 : index
    %c0_16 = arith.constant 0 : index
    %36 = vector.load %arg4[%c0_14, %c0_15, %c0_16] : memref<1x3x128xf32, #tpu.memory_space<vmem>>, vector<1x3x128xf32>
    tpu.vector_store %arg4[%c0_14, %c0_15, %c0_16], %35 {strides = array<i32>} : memref<1x3x128xf32, #tpu.memory_space<vmem>>, vector<1x3x128xf32>,
    return
  }
  func.func @transform_0(%arg0: i32) -> (i32, i32) {
    %c0_i32 = arith.constant 0 : i32
    %c0_i32_0 = arith.constant 0 : i32
    return %arg0, %c0_i32 : i32, i32
  }
  func.func @transform_1(%arg0: i32) -> (i32, i32) {
    %c0_i32 = arith.constant 0 : i32
    %c0_i32_0 = arith.constant 0 : i32
    return %arg0, %c0_i32 : i32, i32
  }
  func.func @transform_2(%arg0: i32) -> (i32, i32) {
    %c0_i32 = arith.constant 0 : i32
    %c0_i32_0 = arith.constant 0 : i32
    %c0_i32_1 = arith.constant 0 : i32
    return %c0_i32, %c0_i32_0 : i32, i32
  }
  func.func @transform_3(%arg0: i32) -> (i32, i32, i32) {
    %c0_i32 = arith.constant 0 : i32
    %c0_i32_0 = arith.constant 0 : i32
    %c0_i32_1 = arith.constant 0 : i32
    return %arg0, %c0_i32, %c0_i32_0 : i32, i32, i32
  }
}

module attributes {stable_mosaic.version = 11 : i64} {
  func.func @_edge_bn_kernel(%arg0: i32, %arg1: memref<40x32xf32, #tpu.memory_space<vmem>>, %arg2: memref<40x128xf32, #tpu.memory_space<vmem>>, %arg3: memref<32x128xf32, #tpu.memory_space<vmem>>, %arg4: memref<1x128xf32, #tpu.memory_space<vmem>>, %arg5: memref<1x128xf32, #tpu.memory_space<vmem>>, %arg6: memref<40x128xf32, #tpu.memory_space<vmem>>) attributes {dimension_semantics = [#tpu.dimension_semantics<parallel>], iteration_bounds = array<i64: 1>, scalar_prefetch = 0 : i64, scratch_operands = 0 : i64, tpu.core_type = #tpu.core_type<tc>, window_params = [{transform_indices = @transform_0, window_bounds = array<i64: 40, 32>}, {transform_indices = @transform_1, window_bounds = array<i64: 40, 128>}, {pipeline_mode = #tpu.pipeline_mode<synchronous>, transform_indices = @transform_2, window_bounds = array<i64: 32, 128>}, {pipeline_mode = #tpu.pipeline_mode<synchronous>, transform_indices = @transform_3, window_bounds = array<i64: 1, 128>}, {pipeline_mode = #tpu.pipeline_mode<synchronous>, transform_indices = @transform_4, window_bounds = array<i64: 1, 128>}, {transform_indices = @transform_5, window_bounds = array<i64: 40, 128>}]} {
    %c0 = arith.constant 0 : index
    %c0_0 = arith.constant 0 : index
    %0 = vector.load %arg1[%c0, %c0_0] : memref<40x32xf32, #tpu.memory_space<vmem>>, vector<40x32xf32>
    %c0_1 = arith.constant 0 : index
    %c0_2 = arith.constant 0 : index
    %1 = vector.load %arg3[%c0_1, %c0_2] : memref<32x128xf32, #tpu.memory_space<vmem>>, vector<32x128xf32>
    %cst = arith.constant dense<0.000000e+00> : vector<40x128xf32>
    %2 = tpu.matmul %0, %1, %cst {dimension_numbers = #tpu.dot_dimension_numbers<[1], [0], [0], [1], [0, 0, 1, 1], [], []>, precision = #tpu.contract_precision<fp32>} : vector<40x32xf32>, vector<32x128xf32>, vector<40x128xf32> -> vector<40x128xf32>
    %c0_3 = arith.constant 0 : index
    %c0_4 = arith.constant 0 : index
    %3 = vector.load %arg2[%c0_3, %c0_4] : memref<40x128xf32, #tpu.memory_space<vmem>>, vector<40x128xf32>
    %cst_5 = arith.constant 1.000000e+00 : f32
    %4 = vector.broadcast %cst_5 : f32 to vector<40x128xf32>
    %5 = arith.addf %4, %2 : vector<40x128xf32>
    %6 = arith.mulf %3, %5 : vector<40x128xf32>
    %c0_6 = arith.constant 0 : index
    %c0_7 = arith.constant 0 : index
    %7 = vector.load %arg4[%c0_6, %c0_7] : memref<1x128xf32, #tpu.memory_space<vmem>>, vector<1x128xf32>
    %8 = vector.broadcast %7 : vector<1x128xf32> to vector<40x128xf32>
    %9 = arith.mulf %6, %8 : vector<40x128xf32>
    %c0_8 = arith.constant 0 : index
    %c0_9 = arith.constant 0 : index
    %10 = vector.load %arg5[%c0_8, %c0_9] : memref<1x128xf32, #tpu.memory_space<vmem>>, vector<1x128xf32>
    %11 = vector.broadcast %10 : vector<1x128xf32> to vector<40x128xf32>
    %12 = arith.addf %9, %11 : vector<40x128xf32>
    %c0_10 = arith.constant 0 : index
    %c0_11 = arith.constant 0 : index
    %13 = vector.load %arg6[%c0_10, %c0_11] : memref<40x128xf32, #tpu.memory_space<vmem>>, vector<40x128xf32>
    tpu.vector_store %arg6[%c0_10, %c0_11], %12 {strides = array<i32>} : memref<40x128xf32, #tpu.memory_space<vmem>>, vector<40x128xf32>,
    return
  }
  func.func @transform_0(%arg0: i32) -> (i32, i32) {
    %c0_i32 = arith.constant 0 : i32
    %c0_i32_0 = arith.constant 0 : i32
    return %arg0, %c0_i32 : i32, i32
  }
  func.func @transform_1(%arg0: i32) -> (i32, i32) {
    %c0_i32 = arith.constant 0 : i32
    %c0_i32_0 = arith.constant 0 : i32
    return %arg0, %c0_i32 : i32, i32
  }
  func.func @transform_2(%arg0: i32) -> (i32, i32) {
    %c0_i32 = arith.constant 0 : i32
    %c0_i32_0 = arith.constant 0 : i32
    %c0_i32_1 = arith.constant 0 : i32
    return %c0_i32, %c0_i32_0 : i32, i32
  }
  func.func @transform_3(%arg0: i32) -> (i32, i32) {
    %c0_i32 = arith.constant 0 : i32
    %c0_i32_0 = arith.constant 0 : i32
    %c0_i32_1 = arith.constant 0 : i32
    return %c0_i32, %c0_i32_0 : i32, i32
  }
  func.func @transform_4(%arg0: i32) -> (i32, i32) {
    %c0_i32 = arith.constant 0 : i32
    %c0_i32_0 = arith.constant 0 : i32
    %c0_i32_1 = arith.constant 0 : i32
    return %c0_i32, %c0_i32_0 : i32, i32
  }
  func.func @transform_5(%arg0: i32) -> (i32, i32) {
    %c0_i32 = arith.constant 0 : i32
    %c0_i32_0 = arith.constant 0 : i32
    return %arg0, %c0_i32 : i32, i32
  }
}

</mosaic_0001>

<bundles_post_ra>
// kernel: tile.9
= control target key start
LH: loop header
LB: loop body
LE: loop exit
PB: predicated region body
PF: predicated region fallthrough
CT: control target
= control target key end

     0   :  { %vm162_vm0 = vcmask 1047556   ;;  %s398_s10 = smov 96   ;;  %vm164_vm1 = vcmask 261120   ;;  %s400_s21 = smov 32   ;;  %vm201_vm2 = vcmask 1048320   ;;  %vm244_vm3 = vcmask 785920   ;;  %s579_s0 = inlined_call_operand.vmem [shape: f32[32,4,32], index: 0, kind: input, shape index: {}]   ;;  %s580_s1 = inlined_call_operand.vmem [shape: f32[32,128], index: 1, kind: output, shape index: {}]  }
   0x1   :  { %v376_v0 = vld [vmem:[%s579_s0 + $0x1c] sm:$0xf]  ;;  %v377_v1 = vld [vmem:[%s579_s0 + $0x18] sm:$0xf]  ;;  %v378_v2 = vld [vmem:[%s579_s0 + $0x14] sm:$0xf] }
   0x2   :  { %128 = vst [vmem:[#allocation0 + $0x38] sm:$0xf] %v376_v0  ;;  %133 = vst [vmem:[#allocation0 + $0x30] sm:$0xf] %v377_v1  ;;  %v379_v3 = vld [vmem:[%s579_s0 + $0x10] sm:$0xf] }
   0x3   :  { %138 = vst [vmem:[#allocation0 + $0x28] sm:$0xf] %v378_v2  ;;  %v380_v4 = vld [vmem:[%s579_s0 + $0xc] sm:$0xf]  ;;  %v381_v5 = vld [vmem:[%s579_s0 + $0x8] sm:$0xf] }
   0x4   :  { %143 = vst [vmem:[#allocation0 + $0x20] sm:$0xf] %v379_v3  ;;  %148 = vst [vmem:[#allocation0 + $0x18] sm:$0xf] %v380_v4  ;;  %v382_v6 = vld [vmem:[%s579_s0 + $0x4] sm:$0xf] }
   0x5   :  { %153 = vst [vmem:[#allocation0 + $0x10] sm:$0xf] %v381_v5  ;;  %v158_v7 = vld [vmem:[%s579_s0] sm:$0xf]  ;;  %157 = vst [vmem:[#allocation0 + $0x8] sm:$0xf] %v382_v6 }
   0x6   :  { %159 = vst [vmem:[#allocation0] sm:$0xf] %v158_v7  ;;  %v360_v8 = vld [vmem:[%s579_s0 + $0x5c] sm:$0xf]  ;;  %v361_v9 = vld [vmem:[%s579_s0 + $0x58] sm:$0xf] }
   0x7   :  { %v362_v10 = vld [vmem:[%s579_s0 + $0x54] sm:$0xf]  ;;  %48 = vst [vmem:[#allocation0 + $0xb8] sm:$0xf] %v360_v8  ;;  %53 = vst [vmem:[#allocation0 + $0xb0] sm:$0xf] %v361_v9 }
   0x8   :  { %58 = vst [vmem:[#allocation0 + $0xa8] sm:$0xf] %v362_v10  ;;  %v363_v11 = vld [vmem:[%s579_s0 + $0x50] sm:$0xf]  ;;  %v364_v12 = vld [vmem:[%s579_s0 + $0x4c] sm:$0xf] }
   0x9   :  { %v365_v13 = vld [vmem:[%s579_s0 + $0x48] sm:$0xf]  ;;  %63 = vst [vmem:[#allocation0 + $0xa0] sm:$0xf] %v363_v11  ;;  %68 = vst [vmem:[#allocation0 + $0x98] sm:$0xf] %v364_v12 }
   0xa   :  { %73 = vst [vmem:[#allocation0 + $0x90] sm:$0xf] %v365_v13  ;;  %v366_v14 = vld [vmem:[%s579_s0 + $0x44] sm:$0xf]  ;;  %v367_v15 = vld [vmem:[%s579_s0 + $0x40] sm:$0xf] }
   0xb   :  { %v368_v16 = vld [vmem:[%s579_s0 + $0x3c] sm:$0xf]  ;;  %78 = vst [vmem:[#allocation0 + $0x88] sm:$0xf] %v366_v14  ;;  %83 = vst [vmem:[#allocation0 + $0x80] sm:$0xf] %v367_v15 }
   0xc   :  { %88 = vst [vmem:[#allocation0 + $0x78] sm:$0xf] %v368_v16  ;;  %v369_v17 = vld [vmem:[%s579_s0 + $0x38] sm:$0xf]  ;;  %v370_v18 = vld [vmem:[%s579_s0 + $0x34] sm:$0xf] }
   0xd   :  { %v371_v19 = vld [vmem:[%s579_s0 + $0x30] sm:$0xf]  ;;  %93 = vst [vmem:[#allocation0 + $0x70] sm:$0xf] %v369_v17  ;;  %98 = vst [vmem:[#allocation0 + $0x68] sm:$0xf] %v370_v18 }
   0xe   :  { %103 = vst [vmem:[#allocation0 + $0x60] sm:$0xf] %v371_v19  ;;  %v372_v20 = vld [vmem:[%s579_s0 + $0x2c] sm:$0xf]  ;;  %v373_v21 = vld [vmem:[%s579_s0 + $0x28] sm:$0xf] }
   0xf   :  { %v374_v22 = vld [vmem:[%s579_s0 + $0x24] sm:$0xf]  ;;  %108 = vst [vmem:[#allocation0 + $0x58] sm:$0xf] %v372_v20  ;;  %113 = vst [vmem:[#allocation0 + $0x50] sm:$0xf] %v373_v21 }
  0x10   :  { %118 = vst [vmem:[#allocation0 + $0x48] sm:$0xf] %v374_v22  ;;  %v375_v23 = vld [vmem:[%s579_s0 + $0x20] sm:$0xf]  ;;  %v352_v24 = vld [vmem:[%s579_s0 + $0x7c] sm:$0xf] }
  0x11   :  { %v353_v25 = vld [vmem:[%s579_s0 + $0x78] sm:$0xf]  ;;  %123 = vst [vmem:[#allocation0 + $0x40] sm:$0xf] %v375_v23  ;;  %8 = vst [vmem:[#allocation0 + $0xf8] sm:$0xf] %v352_v24 }
  0x12   :  { %v196_v26 = vld [vmem:[#allocation0 + $0x3] ss:$8 sm:$0xf0]   ;;  %13 = vst [vmem:[#allocation0 + $0xf0] sm:$0xf] %v353_v25  ;;  %vm287_vm4 = vcmask 523520  }
  0x13   :  { %v354_v27 = vld [vmem:[%s579_s0 + $0x74] sm:$0xf]  ;;  %v194_v28 = vld [vmem:[#allocation0 + $0x3] ss:$8 sm:$0xf]  }
  0x14   :  { %18 = vst [vmem:[#allocation0 + $0xe8] sm:$0xf] %v354_v27  ;;  %v355_v29 = vld [vmem:[%s579_s0 + $0x70] sm:$0xf]  ;;  %v198_v30 = vsel %vm162_vm0, %v196_v26, %v194_v28  ;;  %v356_v31 = vld [vmem:[%s579_s0 + $0x6c] sm:$0xf] }
  0x15   :  { %23 = vst [vmem:[#allocation0 + $0xe0] sm:$0xf] %v355_v29  ;;  %v357_v32 = vld [vmem:[%s579_s0 + $0x68] sm:$0xf]  ;;  %v358_v33 = vld [vmem:[%s579_s0 + $0x64] sm:$0xf]  ;;  %199 = vrot.lane.b32.xlu0 %v198_v30, %s398_s10 }
  0x16   :  { %v217_v34 = vld [vmem:[#allocation0 + $0x83] ss:$8 sm:$0xf0]   ;;  %28 = vst [vmem:[#allocation0 + $0xd8] sm:$0xf] %v356_v31 }
  0x17   :  { %33 = vst [vmem:[#allocation0 + $0xd0] sm:$0xf] %v357_v32  ;;  %38 = vst [vmem:[#allocation0 + $0xc8] sm:$0xf] %v358_v33  ;;  %v359_v35 = vld [vmem:[%s579_s0 + $0x60] sm:$0xf] }
  0x18   :  { %v215_v36 = vld [vmem:[#allocation0 + $0x83] ss:$8 sm:$0xf]   ;;  %43 = vst [vmem:[#allocation0 + $0xc0] sm:$0xf] %v359_v35  ;;  %s399_s0 = smov 64  }
  0x19   :  { %v219_v37 = vsel %vm162_vm0, %v217_v34, %v215_v36  ;;  %v206_v38 = vld [vmem:[#allocation0 + $0x43] ss:$8 sm:$0xf0]   ;;  %v237_v39 = vld [vmem:[#allocation0 + $0x2] ss:$8 sm:$0xf]  }
  0x1a   :  { %220 = vrot.lane.b32.xlu1 %v219_v37, %s398_s10  ;;  %v204_v40 = vld [vmem:[#allocation0 + $0x43] ss:$8 sm:$0xf]   ;;  %v239_v41 = vld [vmem:[#allocation0 + $0x2] ss:$8 sm:$0xf0]  }
  0x1b   :  { %v208_v42 = vsel %vm162_vm0, %v206_v38, %v204_v40  ;;  %v249_v44 = vld [vmem:[#allocation0 + $0x42] ss:$8 sm:$0xf0]   ;;  %v241_v45 = vsel %vm162_vm0, %v239_v41, %v237_v39  ;;  %v280_v52 = vld [vmem:[#allocation0 + $0x1] ss:$8 sm:$0xf]  }
  0x1c   :  { %209 = vrot.lane.b32.xlu0 %v208_v42, %s398_s10  ;;  %v228_v43 = vld [vmem:[#allocation0 + $0xc3] ss:$8 sm:$0xf0]   ;;  %v247_v46 = vld [vmem:[#allocation0 + $0x42] ss:$8 sm:$0xf]  }
  0x1d   :  { %v258_v47 = vld [vmem:[#allocation0 + $0x82] ss:$8 sm:$0xf]   ;;  %v251_v53 = vsel %vm162_vm0, %v249_v44, %v247_v46  ;;  %v282_v55 = vld [vmem:[#allocation0 + $0x1] ss:$8 sm:$0xf0]  }
  0x1e   :  { %v260_v49 = vld [vmem:[#allocation0 + $0x82] ss:$8 sm:$0xf0]   ;;  %v160_v56 = vld [vmem:[#allocation0] ss:$8 sm:$0xf]   ;;  %v284_v4 = vsel %vm162_vm0, %v282_v55, %v280_v52 }
  0x1f   :  { %v226_v48 = vld [vmem:[#allocation0 + $0xc3] ss:$8 sm:$0xf]   ;;  %v271_v51 = vld [vmem:[#allocation0 + $0xc2] ss:$8 sm:$0xf0]   ;;  %v262_v54 = vsel %vm162_vm0, %v260_v49, %v258_v47 }
  0x20   :  { %v230_v50 = vsel %vm162_vm0, %v228_v43, %v226_v48  ;;  %242 = vrot.lane.b32.xlu0 %v241_v45, %s399_s0  ;;  %v269_v57 = vld [vmem:[#allocation0 + $0xc2] ss:$8 sm:$0xf]   ;;  %v161_v58 = vld [vmem:[#allocation0] ss:$8 sm:$0xf0]  }
  0x21   :  { %231 = vrot.lane.b32.xlu1 %v230_v50, %s398_s10  ;;  %v163_v59 = vsel %vm162_vm0, %v161_v58, %v160_v56  ;;  %v176_v60 = vld [vmem:[#allocation0 + $0x80] ss:$8 sm:$0xf]   ;;  %v290_v62 = vld [vmem:[#allocation0 + $0x41] ss:$8 sm:$0xf]   ;;  %v273_v3 = vsel %vm162_vm0, %v271_v51, %v269_v57 }
  0x22   :  { %v178_v61 = vld [vmem:[#allocation0 + $0x80] ss:$8 sm:$0xf0]   ;;  %v292_v63 = vld [vmem:[#allocation0 + $0x41] ss:$8 sm:$0xf0]  }
  0x23   :  { %165 = vst.msk [vmem:[%s580_s1] sm:$0xff] %vm164_vm1, %v163_v59   ;;  %v180_v0 = vsel %vm162_vm0, %v178_v61, %v176_v60  ;;  %v167_v1 = vld [vmem:[#allocation0 + $0x40] ss:$8 sm:$0xf]   ;;  %v294_v11 = vsel %vm162_vm0, %v292_v63, %v290_v62 }
  0x24   :  { %263 = vrot.lane.b32.xlu0 %v262_v54, %s399_s0  ;;  %v169_v2 = vld [vmem:[#allocation0 + $0x40] ss:$8 sm:$0xf0]   ;;  %384 = vst.msk [vmem:[%s580_s1 + $0x10] sm:$0xff] %vm164_vm1, %v180_v0  }
  0x25   :  { %252 = vrot.lane.b32.xlu1 %v251_v53, %s399_s0  ;;  %v171_v5 = vsel %vm162_vm0, %v169_v2, %v167_v1  ;;  %v185_v6 = vld [vmem:[#allocation0 + $0xc0] ss:$8 sm:$0xf]   ;;  %v301_v8 = vld [vmem:[#allocation0 + $0x81] ss:$8 sm:$0xf]  }
  0x26   :  { %v187_v7 = vld [vmem:[#allocation0 + $0xc0] ss:$8 sm:$0xf0]   ;;  %v303_v9 = vld [vmem:[#allocation0 + $0x81] ss:$8 sm:$0xf0]  }
  0x27   :  { %383 = vst.msk [vmem:[%s580_s1 + $0x8] sm:$0xff] %vm164_vm1, %v171_v5   ;;  %v189_v10 = vsel %vm162_vm0, %v187_v7, %v185_v6  ;;  %v305_v12 = vsel %vm162_vm0, %v303_v9, %v301_v8  ;;  %v312_v13 = vld [vmem:[#allocation0 + $0xc1] ss:$8 sm:$0xf]  }
  0x28   :  { %385 = vst.msk [vmem:[%s580_s1 + $0x18] sm:$0xff] %vm164_vm1, %v189_v10   ;;  %285 = vrot.lane.b32.xlu0 %v284_v4, %s400_s21  ;;  %v314_v14 = vld [vmem:[#allocation0 + $0xc1] ss:$8 sm:$0xf0]  }
  0x29   :  { %274 = vrot.lane.b32.xlu1 %v273_v3, %s399_s0  ;;  %v316_v15 = vsel %vm162_vm0, %v314_v14, %v312_v13 }
  0x2c   :  { %306 = vrot.lane.b32.xlu0 %v305_v12, %s400_s21 }
  0x2d   :  { %295 = vrot.lane.b32.xlu1 %v294_v11, %s400_s21 }
  0x31   :  { %317 = vrot.lane.b32.xlu1 %v316_v15, %s400_s21 }
  0x87   :  { %v200_v16 = vpop.permute.xlu0 %199  }
  0x88   :  { %202 = vst.msk [vmem:[%s580_s1] sm:$0xff] %vm201_vm2, %v200_v16  }
  0x8c   :  { %v221_v17 = vpop.permute.xlu1 %220  }
  0x8d   :  { %387 = vst.msk [vmem:[%s580_s1 + $0x10] sm:$0xff] %vm201_vm2, %v221_v17  }
  0x8e   :  { %v210_v18 = vpop.permute.xlu0 %209  }
  0x8f   :  { %386 = vst.msk [vmem:[%s580_s1 + $0x8] sm:$0xff] %vm201_vm2, %v210_v18  }
  0x92   :  { %v243_v20 = vpop.permute.xlu0 %242  }
  0x93   :  { %v232_v19 = vpop.permute.xlu1 %231   ;;  %245 = vst.msk [vmem:[%s580_s1] sm:$0xff] %vm244_vm3, %v243_v20  }
  0x94   :  { %388 = vst.msk [vmem:[%s580_s1 + $0x18] sm:$0xff] %vm201_vm2, %v232_v19  }
  0x96   :  { %v264_v22 = vpop.permute.xlu0 %263  }
  0x97   :  { %v253_v21 = vpop.permute.xlu1 %252   ;;  %390 = vst.msk [vmem:[%s580_s1 + $0x10] sm:$0xff] %vm244_vm3, %v264_v22  }
  0x98   :  { %389 = vst.msk [vmem:[%s580_s1 + $0x8] sm:$0xff] %vm244_vm3, %v253_v21  }
  0x9a   :  { %v286_v24 = vpop.permute.xlu0 %285  }
  0x9b   :  { %v275_v23 = vpop.permute.xlu1 %274   ;;  %288 = vst.msk [vmem:[%s580_s1] sm:$0xff] %vm287_vm4, %v286_v24  }
  0x9c   :  { %391 = vst.msk [vmem:[%s580_s1 + $0x18] sm:$0xff] %vm244_vm3, %v275_v23  }
  0x9e   :  { %v307_v26 = vpop.permute.xlu0 %306  }
  0x9f   :  { %v296_v25 = vpop.permute.xlu1 %295   ;;  %393 = vst.msk [vmem:[%s580_s1 + $0x10] sm:$0xff] %vm287_vm4, %v307_v26  }
  0xa0   :  { %392 = vst.msk [vmem:[%s580_s1 + $0x8] sm:$0xff] %vm287_vm4, %v296_v25  }
  0xa3   :  { %v318_v27 = vpop.permute.xlu1 %317  }
  0xa4   :  { %394 = vst.msk [vmem:[%s580_s1 + $0x18] sm:$0xff] %vm287_vm4, %v318_v27  }

// kernel: embed_coeffs.3
= control target key start
LH: loop header
LB: loop body
LE: loop exit
PB: predicated region body
PF: predicated region fallthrough
CT: control target
= control target key end

     0   :  { %8 = vsyncpa [#allocation3], 0  ;;  %s2388_s12 = smov [#allocation2]   ;;  %s3116_s0 = inlined_call_operand.vmem [shape: f32[24,64], index: 0, kind: input, shape index: {}]   ;;  %s3117_s1 = inlined_call_operand.hbm [shape: f32[64,128], index: 1, kind: input, shape index: {}]   ;;  %s3118_s2 = inlined_call_operand.vmem [shape: f32[128,128], index: 2, kind: input, shape index: {}]   ;;  %s3119_s3 = inlined_call_operand.vmem [shape: f32[24,128], index: 3, kind: output, shape index: {}]  }
   0x1   :  { %s16_s13 = sshll.u32 %s2388_s12, 4  ;;  %s2364_s16 = scalar_lea.hbm %s3117_s1, 1024  ;;  %s17_s13 = int_to_ptr.vmem [resolvable:$true] %s16_s13 }
   0x2   :  { %p2365_p0 = scmp.ne.s32.totalorder %s3117_s1, %s2364_s16  ;;  %p2368_p1 = scmp.lt.u32.totalorder %s2364_s16, %s3117_s1 }
   0x4   :  { %p2370_p2 = pnand %p2368_p1, %p2365_p0 }
   0x6   :  { %2373 = shalt.err (!%p2370_p2)
}
   0x7   :  { %s2374_s21 = scalar_lea.vmem %s17_s13, 1024  ;;  %p2379_p4 = scmp.lt.s32.totalorder %s17_s13, %s17_s13 }
   0x8   :  { %p2375_p3 = scmp.ne.s32.totalorder %s17_s13, %s2374_s21  ;;  %p2380_p5 = scmp.lt.s32.totalorder %s2374_s21, %s2374_s21 }
   0xa   :  { %p2381_p6 = por %p2380_p5, %p2379_p4 }
   0xc   :  { %p2382_p7 = pnand %p2381_p6, %p2375_p3 }
   0xe   :  { %2385 = shalt.err (!%p2382_p7)
}
   0xf   :  { %s2389_s22 = smov 128   ;;  %s2390_s23 = smov 8  }
  0x10   :  { %22 = dma.hbm_to_vmem [thread:$0]  %s3117_s1, 1024, %s17_s13, [#allocation3], %s2389_s22, %s2389_s22, %s2390_s23  }
  0x11   :  { %2386 = dma.done.wait [#allocation3], 1024  }
  0x12   :  { %2387 = vsyncadd [#allocation3], 4294966272  ;;  %v2391_v0 = vmov 0.0|0.0   ;;  %vm2392_vm0 = vmmov 0   ;;  %v2393_v1 = vmov 0.0   ;;  %v31_v2 = vld [vmem:[#allocation2] sm:$0xff] }
  0x13   :  { %2047 = vmatprep.subr.bf16.mxu0 %v2391_v0  ;;  %1667 = vmatprep.mubr.msk.f32.mxu0 %vm2392_vm0, %v2393_v1  ;;  %v32_v3 = vld [vmem:[#allocation2 + $0x8] sm:$0xff]  ;;  %v33_v4 = vld [vmem:[#allocation2 + $0x10] sm:$0xff]  ;;  %v50_v5 = vand.u32 4294901760, %v31_v2  ;;  %v34_v7 = vld [vmem:[#allocation2 + $0x18] sm:$0xff]  ;;  %vm39_vm1 = vcmask 523264  }
  0x14   :  { %2143 = vmatprep.subr.bf16.mxu1 %v2391_v0  ;;  %1874 = vmatprep.mubr.msk.f32.mxu1 %vm2392_vm0, %v2393_v1  ;;  %v53_v6 = vand.u32 4294901760, %v32_v3  ;;  %v56_v8 = vand.u32 4294901760, %v33_v4  ;;  %v35_v9 = vld [vmem:[#allocation2 + $0x20] sm:$0xff]  ;;  %v59_v10 = vand.u32 4294901760, %v34_v7  ;;  %v36_v11 = vld [vmem:[#allocation2 + $0x28] sm:$0xff]  ;;  %v37_v12 = vld [vmem:[#allocation2 + $0x30] sm:$0xff] }
  0x15   :  { %v28_v13 = vld [vmem:[%s3116_s0] sm:$0xff]  ;;  %v2437_v15 = vsub.f32 %v31_v2, %v50_v5  ;;  %v38_v18 = vld [vmem:[#allocation2 + $0x38] sm:$0xff]  ;;  %v62_v20 = vand.u32 4294901760, %v35_v9  ;;  %v65_v22 = vand.u32 4294901760, %v36_v11  ;;  %v68_v23 = vand.u32 4294901760, %v37_v12  ;;  %v29_v29 = vld [vmem:[%s3116_s0 + $0x8] sm:$0xff] }
  0x16   :  { %v2435_v14 = vpack.c.bf16 %v53_v6, %v50_v5  ;;  %v2439_v16 = vsub.f32 %v32_v3, %v53_v6  ;;  %v2441_v17 = vsub.f32 %v33_v4, %v56_v8  ;;  %v2443_v19 = vsub.f32 %v34_v7, %v59_v10  ;;  %v30_v39 = vld [vmem:[%s3116_s0 + $0x10] sm:$0xff]  ;;  %v2522_v63 = vld [vmem:[%s3118_s2] sm:$0xff]  ;;  %v2527_v2 = vld [vmem:[%s3118_s2 + $0x8] sm:$0xff] }
  0x17   :  { %v2446_v21 = vpack.c.bf16 %v59_v10, %v56_v8  ;;  %v41_v24 = vsel %vm39_vm1, %v28_v13, 0  ;;  %v71_v25 = vand.u32 4294901760, %v38_v18  ;;  %v155_v27 = vand.u32 4294901760, %v2437_v15 }
  0x18   :  { %2049 = vmatpush3.bf16.msra.mxu0 %v2435_v14  ;;  %v2450_v26 = vand.u32 4294901760, %v41_v24  ;;  %v162_v28 = vand.u32 4294901760, %v2439_v16  ;;  %v2457_v30 = vsub.f32 %v35_v9, %v62_v20  ;;  %v169_v31 = vand.u32 4294901760, %v2441_v17 }
  0x19   :  { %2050 = vmatprep.subr.bf16.mxu0 %v2391_v0  ;;  %v176_v32 = vand.u32 4294901760, %v2443_v19  ;;  %v2461_v33 = vsub.f32 %v36_v11, %v65_v22  ;;  %v2467_v35 = vpack.c.bf16 %v65_v22, %v62_v20  ;;  %v156_v36 = vsub.f32 %v2437_v15, %v155_v27 }
  0x1a   :  { %v2464_v34 = vsub.f32 %v41_v24, %v2450_v26  ;;  %v163_v37 = vsub.f32 %v2439_v16, %v162_v28  ;;  %v44_v38 = vsel %vm39_vm1, %v29_v29, 0  ;;  %v2480_v40 = vpack.c.bf16 %v71_v25, %v68_v23 }
  0x1b   :  { %v170_v42 = vsub.f32 %v2441_v17, %v169_v31  ;;  %v177_v43 = vsub.f32 %v2443_v19, %v176_v32  ;;  %v2489_v44 = vand.u32 4294901760, %v44_v38  ;;  %v183_v45 = vand.u32 4294901760, %v2457_v30 }
  0x1c   :  { %2052 = vmatpush3.bf16.msra.mxu0 %v2446_v21  ;;  %v124_v41 = vand.u32 4294901760, %v2464_v34  ;;  %v2492_v46 = vsub.f32 %v37_v12, %v68_v23  ;;  %v190_v48 = vand.u32 4294901760, %v2461_v33  ;;  %v47_v49 = vsel %vm39_vm1, %v30_v39, 0 }
  0x1d   :  { %2053 = vmatprep.subr.bf16.mxu0 %v2391_v0  ;;  %v2500_v50 = vsub.f32 %v38_v18, %v71_v25  ;;  %v157_v51 = vand.u32 4294901760, %v156_v36  ;;  %v164_v52 = vand.u32 4294901760, %v163_v37  ;;  %v2503_v53 = vsub.f32 %v44_v38, %v2489_v44 }
  0x1e   :  { %v125_v47 = vsub.f32 %v2464_v34, %v124_v41  ;;  %v2506_v54 = vand.u32 4294901760, %v47_v49  ;;  %v171_v55 = vand.u32 4294901760, %v170_v42  ;;  %v178_v56 = vand.u32 4294901760, %v177_v43 }
  0x1f   :  { %v134_v57 = vand.u32 4294901760, %v2503_v53  ;;  %v184_v58 = vsub.f32 %v2457_v30, %v183_v45  ;;  %v191_v60 = vsub.f32 %v2461_v33, %v190_v48  ;;  %v197_v62 = vand.u32 4294901760, %v2492_v46 }
  0x20   :  { %2055 = vmatpush3.bf16.msra.mxu0 %v2467_v35  ;;  %v126_v59 = vand.u32 4294901760, %v125_v47  ;;  %v2516_v61 = vsub.f32 %v47_v49, %v2506_v54  ;;  %v2060_v3 = vpack.c.bf16 %v164_v52, %v157_v51  ;;  %v204_v5 = vand.u32 4294901760, %v2500_v50 }
  0x21   :  { %2056 = vmatprep.subr.bf16.mxu0 %v2391_v0  ;;  %v135_v4 = vsub.f32 %v2503_v53, %v134_v57  ;;  %v2063_v7 = vpack.c.bf16 %v178_v56, %v171_v55  ;;  %v185_v8 = vand.u32 4294901760, %v184_v58  ;;  %v710_v9 = vand.u32 4294901760, %v2522_v63 }
  0x22   :  { %v144_v6 = vand.u32 4294901760, %v2516_v61  ;;  %v713_v10 = vand.u32 4294901760, %v2527_v2  ;;  %v192_v12 = vand.u32 4294901760, %v191_v60  ;;  %v198_v18 = vsub.f32 %v2492_v46, %v197_v62 }
  0x23   :  { %v136_v11 = vand.u32 4294901760, %v135_v4  ;;  %v205_v20 = vsub.f32 %v2500_v50, %v204_v5  ;;  %v2552_v22 = vsub.f32 %v2522_v63, %v710_v9  ;;  %v2072_v52 = vpack.c.bf16 %v2439_v16, %v2437_v15 }
  0x24   :  { %2058 = vmatpush3.bf16.msra.mxu0 %v2480_v40  ;;  %v145_v13 = vsub.f32 %v2516_v61, %v144_v6  ;;  %v2557_v23 = vsub.f32 %v2527_v2, %v713_v10  ;;  %v2066_v29 = vpack.c.bf16 %v192_v12, %v185_v8  ;;  %v199_v37 = vand.u32 4294901760, %v198_v18  ;;  %v2750_v8 = vld [vmem:[%s3118_s2 + $0x48] sm:$0xff]  ;;  %v2782_v2 = vld [vmem:[%s3118_s2 + $0x50] sm:$0xff] }
  0x25   :  { %2059 = vmatprep.subr.bf16.mxu0 %v2391_v0  ;;  %v823_v24 = vand.u32 4294901760, %v2552_v22  ;;  %v206_v38 = vand.u32 4294901760, %v205_v20  ;;  %v2075_v55 = vpack.c.bf16 %v2443_v19, %v2441_v17  ;;  %v2078_v56 = vpack.c.bf16 %v2461_v33, %v2457_v30  ;;  %v696_v17 = vld [vmem:[%s3118_s2 + $0x18] sm:$0xff]  ;;  %v2690_v30 = vld [vmem:[%s3118_s2 + $0x28] sm:$0xff] }
  0x26   :  { %v830_v25 = vand.u32 4294901760, %v2557_v23  ;;  %v146_v36 = vand.u32 4294901760, %v145_v13  ;;  %v2081_v58 = vpack.c.bf16 %v2500_v50, %v2492_v46  ;;  %v2099_v60 = vpack.c.bf16 %v176_v32, %v169_v31  ;;  %v2720_v46 = vld [vmem:[%s3118_s2 + $0x38] sm:$0xff] }
  0x27   :  { %1668 = vmatmul.mubr.f32.vlgmr.msra.gmra.mrb[0].mxu0 %v126_v59  ;;  %v824_v39 = vsub.f32 %v2552_v22, %v823_v24  ;;  %v2069_v49 = vpack.c.bf16 %v206_v38, %v199_v37  ;;  %v2096_v59 = vpack.c.bf16 %v162_v28, %v155_v27  ;;  %v2102_v15 = vpack.c.bf16 %v190_v48, %v183_v45  ;;  %v2685_v28 = vld [vmem:[%s3118_s2 + $0x20] sm:$0xff]  ;;  %v2715_v45 = vld [vmem:[%s3118_s2 + $0x30] sm:$0xff] }
  0x28   :  { %2061 = vmatpush3.bf16.msra.mxu0 %v2060_v3  ;;  %1670 = vmatprep.mubr.msk.f32.mxu0 %vm2392_vm0, %v2393_v1  ;;  %v831_v42 = vsub.f32 %v2557_v23, %v830_v25  ;;  %v2105_v16 = vpack.c.bf16 %v204_v5, %v197_v62  ;;  %v722_v33 = vand.u32 4294901760, %v2685_v28  ;;  %v737_v18 = vand.u32 4294901760, %v2750_v8 }
  0x29   :  { %2062 = vmatprep.subr.bf16.mxu0 %v2391_v0  ;;  %v825_v43 = vand.u32 4294901760, %v824_v39 }
  0x2a   :  { %v832_v47 = vand.u32 4294901760, %v831_v42  ;;  %v2771_v39 = vsub.f32 %v2750_v8, %v737_v18 }
  0x2b   :  { %1671 = vmatmul.mubr.f32.gmra.mrb[2].mxu0 %v136_v11 }
  0x2c   :  { %2064 = vmatpush3.bf16.msra.mxu0 %v2063_v7  ;;  %1673 = vmatprep.mubr.msk.f32.mxu0 %vm2392_vm0, %v2393_v1  ;;  %v2144_v51 = vpack.c.bf16 %v832_v47, %v825_v43  ;;  %v2745_v7 = vld [vmem:[%s3118_s2 + $0x40] sm:$0xff]  ;;  %v886_v43 = vand.u32 4294901760, %v2771_v39  ;;  %v740_v47 = vand.u32 4294901760, %v2782_v2 }
  0x2d   :  { %2065 = vmatprep.subr.bf16.mxu0 %v2391_v0  ;;  %v734_v13 = vand.u32 4294901760, %v2745_v7 }
  0x2e   :  { %2145 = vmatpush3.bf16.msra.mxu1 %v2144_v51 }
  0x2f   :  { %1674 = vmatmul.mubr.f32.gmra.mrb[4].mxu0 %v146_v36  ;;  %2146 = vmatprep.subr.bf16.mxu1 %v2391_v0  ;;  %v2761_v36 = vpack.c.bf16 %v713_v10, %v710_v9  ;;  %v2766_v38 = vsub.f32 %v2745_v7, %v734_v13  ;;  %v2787_v9 = vld [vmem:[%s3118_s2 + $0x58] sm:$0xff] }
  0x30   :  { %2067 = vmatpush3.bf16.msra.mxu0 %v2066_v29  ;;  %1692 = vmatprep.mubr.msk.f32.mxu0 %vm2392_vm0, %v2393_v1 }
  0x31   :  { %2068 = vmatprep.subr.bf16.mxu0 %v2391_v0  ;;  %v879_v10 = vand.u32 4294901760, %v2766_v38 }
  0x34   :  { %2070 = vmatpush3.bf16.msra.mxu0 %v2069_v49  ;;  %v743_v49 = vand.u32 4294901760, %v2787_v9 }
  0x35   :  { %2071 = vmatprep.subr.bf16.mxu0 %v2391_v0 }
  0x36   :  { %v2892_v7 = vpack.c.bf16 %v743_v49, %v740_v47 }
  0x37   :  { %1693 = vmatmul.mubr.f32.vlgmr.msra.gmra.mrb[0].mxu0 %v2450_v26 }
  0x38   :  { %2073 = vmatpush3.bf16.msra.mxu0 %v2072_v52  ;;  %1695 = vmatprep.mubr.msk.f32.mxu0 %vm2392_vm0, %v2393_v1 }
  0x39   :  { %2074 = vmatprep.subr.bf16.mxu0 %v2391_v0 }
  0x3b   :  { %1696 = vmatmul.mubr.f32.gmra.mrb[2].mxu0 %v2489_v44 }
  0x3c   :  { %2076 = vmatpush3.bf16.msra.mxu0 %v2075_v55  ;;  %1698 = vmatprep.mubr.msk.f32.mxu0 %vm2392_vm0, %v2393_v1 }
  0x3d   :  { %2077 = vmatprep.subr.bf16.mxu0 %v2391_v0 }
  0x3f   :  { %1699 = vmatmul.mubr.f32.gmra.mrb[4].mxu0 %v2506_v54 }
  0x40   :  { %2079 = vmatpush3.bf16.msra.mxu0 %v2078_v56  ;;  %1717 = vmatprep.mubr.msk.f32.mxu0 %vm2392_vm0, %v2393_v1  ;;  %v880_v56 = vsub.f32 %v2766_v38, %v879_v10 }
  0x41   :  { %2080 = vmatprep.subr.bf16.mxu0 %v2391_v0 }
  0x44   :  { %2082 = vmatpush3.bf16.msra.mxu0 %v2081_v58  ;;  %v887_v58 = vsub.f32 %v2771_v39, %v886_v43 }
  0x45   :  { %2083 = vmatprep.subr.bf16.mxu0 %v2391_v0 }
  0x47   :  { %1718 = vmatmul.mubr.f32.vlgmr.msra.gmra.mrb[0].mxu0 %v2464_v34  ;;  %v725_v34 = vand.u32 4294901760, %v2690_v30 }
  0x48   :  { %2085 = vmatpush3.bf16.msra.mxu0 %v2435_v14  ;;  %1720 = vmatprep.mubr.msk.f32.mxu0 %vm2392_vm0, %v2393_v1 }
  0x49   :  { %2086 = vmatprep.subr.bf16.mxu0 %v2391_v0 }
  0x4b   :  { %1721 = vmatmul.mubr.f32.gmra.mrb[2].mxu0 %v2503_v53 }
  0x4c   :  { %2088 = vmatpush3.bf16.msra.mxu0 %v2446_v21  ;;  %1723 = vmatprep.mubr.msk.f32.mxu0 %vm2392_vm0, %v2393_v1 }
  0x4d   :  { %2089 = vmatprep.subr.bf16.mxu0 %v2391_v0 }
  0x4f   :  { %1724 = vmatmul.mubr.f32.gmra.mrb[4].mxu0 %v2516_v61  ;;  %v731_v61 = vand.u32 4294901760, %v2720_v46 }
  0x50   :  { %2091 = vmatpush3.bf16.msra.mxu0 %v2467_v35  ;;  %1742 = vmatprep.mubr.msk.f32.mxu0 %vm2392_vm0, %v2393_v1 }
  0x51   :  { %2092 = vmatprep.subr.bf16.mxu0 %v2391_v0 }
  0x54   :  { %2094 = vmatpush3.bf16.msra.mxu0 %v2480_v40 }
  0x55   :  { %2095 = vmatprep.subr.bf16.mxu0 %v2391_v0 }
  0x57   :  { %1743 = vmatmul.mubr.f32.vlgmr.msra.gmra.mrb[0].mxu0 %v124_v41  ;;  %v2705_v41 = vsub.f32 %v2685_v28, %v722_v33  ;;  %v707_v28 = vld [vmem:[%s3118_s2 + $0x70] sm:$0xff] }
  0x58   :  { %2097 = vmatpush3.bf16.msra.mxu0 %v2096_v59  ;;  %1745 = vmatprep.mubr.msk.f32.mxu0 %vm2392_vm0, %v2393_v1  ;;  %v2807_v59 = vsub.f32 %v2782_v2, %v740_v47 }
  0x59   :  { %2098 = vmatprep.subr.bf16.mxu0 %v2391_v0  ;;  %v851_v53 = vand.u32 4294901760, %v2705_v41 }
  0x5b   :  { %1746 = vmatmul.mubr.f32.gmra.mrb[2].mxu0 %v134_v57  ;;  %v728_v57 = vand.u32 4294901760, %v2715_v45  ;;  %v852_v3 = vsub.f32 %v2705_v41, %v851_v53 }
  0x5c   :  { %2100 = vmatpush3.bf16.msra.mxu0 %v2099_v60  ;;  %1748 = vmatprep.mubr.msk.f32.mxu0 %vm2392_vm0, %v2393_v1 }
  0x5d   :  { %2101 = vmatprep.subr.bf16.mxu0 %v2391_v0  ;;  %v2735_v5 = vsub.f32 %v2715_v45, %v728_v57  ;;  %v853_v11 = vand.u32 4294901760, %v852_v3 }
  0x5f   :  { %1749 = vmatmul.mubr.f32.gmra.mrb[4].mxu0 %v144_v6  ;;  %v2740_v6 = vsub.f32 %v2720_v46, %v731_v61  ;;  %v865_v20 = vand.u32 4294901760, %v2735_v5 }
  0x60   :  { %2103 = vmatpush3.bf16.msra.mxu0 %v2102_v15  ;;  %1767 = vmatprep.mubr.msk.f32.mxu0 %vm2392_vm0, %v2393_v1  ;;  %v2812_v15 = vsub.f32 %v2787_v9, %v743_v49  ;;  %v2180_v49 = vpack.c.bf16 %v2771_v39, %v2766_v38 }
  0x61   :  { %2104 = vmatprep.subr.bf16.mxu0 %v2391_v0  ;;  %v872_v29 = vand.u32 4294901760, %v2740_v6  ;;  %v866_v42 = vsub.f32 %v2735_v5, %v865_v20  ;;  %v2177_v47 = vpack.c.bf16 %v2740_v6, %v2735_v5 }
  0x63   :  { %v873_v63 = vsub.f32 %v2740_v6, %v872_v29  ;;  %v867_v51 = vand.u32 4294901760, %v866_v42 }
  0x64   :  { %2106 = vmatpush3.bf16.msra.mxu0 %v2105_v16  ;;  %v705_v16 = vld [vmem:[%s3118_s2 + $0x60] sm:$0xff] }
  0x65   :  { %2107 = vmatprep.subr.bf16.mxu0 %v2391_v0  ;;  %v874_v52 = vand.u32 4294901760, %v873_v63 }
  0x67   :  { %1768 = vmatmul.mubr.f32.vlgmr.msra.gmra.mrb[0].mxu0 %v2450_v26  ;;  %v2153_v60 = vpack.c.bf16 %v874_v52, %v867_v51  ;;  %v2856_v52 = vpack.c.bf16 %v731_v61, %v728_v57 }
  0x68   :  { %2109 = vmatpush3.bf16.msra.mxu0 %v2435_v14  ;;  %1770 = vmatprep.mubr.msk.f32.mxu0 %vm2392_vm0, %v2393_v1  ;;  %v695_v14 = vld [vmem:[%s3118_s2 + $0x10] sm:$0xff] }
  0x69   :  { %2110 = vmatprep.subr.bf16.mxu0 %v2391_v0  ;;  %v716_v19 = vand.u32 4294901760, %v695_v14 }
  0x6b   :  { %1771 = vmatmul.mubr.f32.gmra.mrb[2].mxu0 %v2489_v44 }
  0x6c   :  { %2112 = vmatpush3.bf16.msra.mxu0 %v2446_v21  ;;  %1773 = vmatprep.mubr.msk.f32.mxu0 %vm2392_vm0, %v2393_v1  ;;  %v719_v21 = vand.u32 4294901760, %v696_v17 }
  0x6d   :  { %2113 = vmatprep.subr.bf16.mxu0 %v2391_v0 }
  0x6e   :  { %v2680_v27 = vsub.f32 %v696_v17, %v719_v21  ;;  %v2796_v55 = vpack.c.bf16 %v719_v21, %v716_v19  ;;  %v881_v17 = vand.u32 4294901760, %v880_v56  ;;  %v893_v21 = vand.u32 4294901760, %v2807_v59 }
  0x6f   :  { %1774 = vmatmul.mubr.f32.gmra.mrb[4].mxu0 %v2506_v54 }
  0x70   :  { %2115 = vmatpush3.bf16.msra.mxu0 %v2467_v35  ;;  %1792 = vmatprep.mubr.msk.f32.mxu0 %vm2392_vm0, %v2393_v1  ;;  %v844_v32 = vand.u32 4294901760, %v2680_v27  ;;  %v894_v3 = vsub.f32 %v2807_v59, %v893_v21 }
  0x71   :  { %2116 = vmatprep.subr.bf16.mxu0 %v2391_v0 }
  0x74   :  { %2118 = vmatpush3.bf16.msra.mxu0 %v2480_v40  ;;  %v845_v40 = vsub.f32 %v2680_v27, %v844_v32 }
  0x75   :  { %2119 = vmatprep.subr.bf16.mxu0 %v2391_v0 }
  0x76   :  { %v846_v50 = vand.u32 4294901760, %v845_v40  ;;  %v900_v40 = vand.u32 4294901760, %v2812_v15 }
  0x77   :  { %1793 = vmatmul.mubr.f32.vlgmr.msra.gmra.mrb[0].mxu0 %v2450_v26  ;;  %v2678_v26 = vsub.f32 %v695_v14, %v716_v19  ;;  %v706_v14 = vld [vmem:[%s3118_s2 + $0x68] sm:$0xff]  ;;  %v888_v19 = vand.u32 4294901760, %v887_v58 }
  0x78   :  { %1795 = vmatprep.mubr.msk.f32.mxu0 %vm2392_vm0, %v2393_v1  ;;  %2121 = vmatpush3.bf16.msra.mxu0 %v2761_v36 }
  0x79   :  { %v837_v31 = vand.u32 4294901760, %v2678_v26  ;;  %2122 = vmatprep.subr.bf16.mxu0 %v2391_v0  ;;  %v2171_v2 = vpack.c.bf16 %v2680_v27, %v2678_v26 }
  0x7b   :  { %1796 = vmatmul.mubr.f32.gmra.mrb[2].mxu0 %v2489_v44  ;;  %v838_v35 = vsub.f32 %v2678_v26, %v837_v31  ;;  %v2710_v44 = vsub.f32 %v2690_v30, %v725_v34  ;;  %v708_v30 = vld [vmem:[%s3118_s2 + $0x78] sm:$0xff] }
  0x7c   :  { %1798 = vmatprep.mubr.msk.f32.mxu0 %vm2392_vm0, %v2393_v1  ;;  %2124 = vmatpush3.bf16.msra.mxu0 %v2796_v55  ;;  %v755_v42 = vand.u32 4294901760, %v708_v30 }
  0x7d   :  { %v839_v48 = vand.u32 4294901760, %v838_v35  ;;  %v746_v35 = vand.u32 4294901760, %v705_v16  ;;  %2125 = vmatprep.subr.bf16.mxu0 %v2391_v0  ;;  %v2174_v9 = vpack.c.bf16 %v2710_v44, %v2705_v41 }
  0x7f   :  { %1799 = vmatmul.mubr.f32.gmra.mrb[4].mxu0 %v2506_v54  ;;  %v858_v54 = vand.u32 4294901760, %v2710_v44  ;;  %v2147_v62 = vpack.c.bf16 %v846_v50, %v839_v48  ;;  %v749_v48 = vand.u32 4294901760, %v706_v14  ;;  %v2829_v50 = vpack.c.bf16 %v725_v34, %v722_v33 }
  0x80   :  { %1833 = vmatprep.mubr.msk.f32.mxu0 %vm2392_vm0, %v2393_v1  ;;  %v895_v33 = vand.u32 4294901760, %v894_v3 }
  0x81   :  { %v859_v4 = vsub.f32 %v2710_v44, %v858_v54  ;;  %2148 = vmatpush3.bf16.msra.mxu1 %v2147_v62  ;;  %v2156_v62 = vpack.c.bf16 %v888_v19, %v881_v17  ;;  %2127 = vmatpush3.bf16.msra.mxu0 %v2829_v50  ;;  %v2877_v17 = vpack.c.bf16 %v737_v18, %v734_v13 }
  0x82   :  { %2149 = vmatprep.subr.bf16.mxu1 %v2391_v0  ;;  %2128 = vmatprep.subr.bf16.mxu0 %v2391_v0  ;;  %v2897_v13 = vpack.c.bf16 %v749_v48, %v746_v35 }
  0x83   :  { %v860_v12 = vand.u32 4294901760, %v859_v4  ;;  %v2834_v4 = vsub.f32 %v705_v16, %v746_v35  ;;  %v2183_v35 = vpack.c.bf16 %v2812_v15, %v2807_v59 }
  0x85   :  { %v2150_v37 = vpack.c.bf16 %v860_v12, %v853_v11  ;;  %v901_v11 = vsub.f32 %v2812_v15, %v900_v40  ;;  %v2839_v12 = vsub.f32 %v706_v14, %v749_v48  ;;  %v907_v34 = vand.u32 4294901760, %v2834_v4  ;;  %2130 = vmatpush3.bf16.msra.mxu0 %v2856_v52 }
  0x86   :  { %2131 = vmatprep.subr.bf16.mxu0 %v2391_v0 }
  0x87   :  { %2151 = vmatpush3.bf16.msra.mxu1 %v2150_v37  ;;  %v752_v37 = vand.u32 4294901760, %v707_v28  ;;  %v902_v63 = vand.u32 4294901760, %v901_v11  ;;  %v914_v51 = vand.u32 4294901760, %v2839_v12  ;;  %v908_v56 = vsub.f32 %v2834_v4, %v907_v34 }
  0x88   :  { %2152 = vmatprep.subr.bf16.mxu1 %v2391_v0  ;;  %v2186_v48 = vpack.c.bf16 %v2839_v12, %v2834_v4 }
  0x89   :  { %v2861_v58 = vsub.f32 %v707_v28, %v752_v37  ;;  %v2159_v16 = vpack.c.bf16 %v902_v63, %v895_v33  ;;  %v915_v14 = vsub.f32 %v2839_v12, %v914_v51  ;;  %v909_v45 = vand.u32 4294901760, %v908_v56  ;;  %2133 = vmatpush3.bf16.msra.mxu0 %v2877_v17 }
  0x8a   :  { %2134 = vmatprep.subr.bf16.mxu0 %v2391_v0  ;;  %v2901_v18 = vpack.c.bf16 %v755_v42, %v752_v37  ;;  %v2234_v26 = vpack.c.bf16 %v914_v51, %v907_v34 }
  0x8b   :  { %2154 = vmatpush3.bf16.msra.mxu1 %v2153_v60  ;;  %v2863_v60 = vsub.f32 %v708_v30, %v755_v42  ;;  %v921_v46 = vand.u32 4294901760, %v2861_v58  ;;  %v916_v61 = vand.u32 4294901760, %v915_v14 }
  0x8c   :  { %2155 = vmatprep.subr.bf16.mxu1 %v2391_v0 }
  0x8d   :  { %v3120_v57 = vand.u32 4294901760, %v2863_v60  ;;  %v922_v19 = vsub.f32 %v2861_v58, %v921_v46  ;;  %v2162_v3 = vpack.c.bf16 %v916_v61, %v909_v45  ;;  %2136 = vmatpush3.bf16.msra.mxu0 %v2892_v7  ;;  %v2189_v30 = vpack.c.bf16 %v2863_v60, %v2861_v58 }
  0x8e   :  { %2137 = vmatprep.subr.bf16.mxu0 %v2391_v0  ;;  %v3121_v27 = vand.u32 4294901760, %v2863_v60 }
  0x8f   :  { %2157 = vmatpush3.bf16.msra.mxu1 %v2156_v62  ;;  %v929_v62 = vsub.f32 %v2863_v60, %v3120_v57  ;;  %v923_v11 = vand.u32 4294901760, %v922_v19 }
  0x90   :  { %2158 = vmatprep.subr.bf16.mxu1 %v2391_v0 }
  0x91   :  { %v930_v28 = vand.u32 4294901760, %v929_v62  ;;  %2139 = vmatpush3.bf16.msra.mxu0 %v2897_v13 }
  0x92   :  { %2140 = vmatprep.subr.bf16.mxu0 %v2391_v0 }
  0x93   :  { %2160 = vmatpush3.bf16.msra.mxu1 %v2159_v16  ;;  %v2165_v8 = vpack.c.bf16 %v930_v28, %v923_v11 }
  0x94   :  { %2161 = vmatprep.subr.bf16.mxu1 %v2391_v0 }
  0x95   :  { %2142 = vmatpush3.bf16.msra.mxu0 %v2901_v18 }
  0x96   :  { %2239 = vmatprep.subr.bf16.mxu0 %v2391_v0 }
  0x97   :  { %2163 = vmatpush3.bf16.msra.mxu1 %v2162_v3 }
  0x98   :  { %2164 = vmatprep.subr.bf16.mxu1 %v2391_v0 }
  0x9b   :  { %2166 = vmatpush3.bf16.msra.mxu1 %v2165_v8 }
  0x9c   :  { %2167 = vmatprep.subr.bf16.mxu1 %v2391_v0 }
 0x14a   :  { %v656_v33 = vpop.f32.mrb[0].mxu0 }
 0x14b   :  { %v1465_v37 = vmul.f32 -1.442695, %v656_v33  ;;  %v1794_v42 = vpop.f32.mrb[1].mxu0 }
 0x14d   :  { %2340 = vpow2.f32 %v1465_v37  ;;  %v2168_v37 = vpack.c.bf16 %v2557_v23, %v2552_v22  ;;  %v2222_v22 = vpack.c.bf16 %v858_v54, %v851_v53  ;;  %v2225_v23 = vpack.c.bf16 %v872_v29, %v865_v20 }
 0x14e   :  { %v662_v63 = vpop.f32.mrb[2].mxu0 }
 0x14f   :  { %v1466_v56 = vmul.f32 -1.442695, %v662_v63  ;;  %v1797_v16 = vpop.f32.mrb[3].mxu0 }
 0x151   :  { %2342 = vpow2.f32 %v1466_v56 }
 0x152   :  { %v668_v14 = vpop.f32.mrb[4].mxu0 }
 0x153   :  { %v1467_v45 = vmul.f32 -1.442695, %v668_v14  ;;  %v1800_v61 = vpop.f32.mrb[5].mxu0 }
 0x155   :  { %2344 = vpow2.f32 %v1467_v45 }
 0x157   :  { %v2341_v19 = vpop.eup %2340 }
 0x158   :  { %v681_v62 = vadd.f32 1.0, %v2341_v19 }
 0x15a   :  { %2346 = vrcp.f32 %v681_v62 }
 0x15b   :  { %v2343_v3 = vpop.eup %2342 }
 0x15c   :  { %v682_v11 = vadd.f32 1.0, %v2343_v3 }
 0x15e   :  { %2348 = vrcp.f32 %v682_v11 }
 0x15f   :  { %v2345_v28 = vpop.eup %2344 }
 0x160   :  { %v683_v8 = vadd.f32 1.0, %v2345_v28 }
 0x162   :  { %2350 = vrcp.f32 %v683_v8 }
 0x164   :  { %v2347_v57 = vpop.eup %2346 }
 0x165   :  { %v690_v42 = vmul.f32 %v2347_v57, %v656_v33 }
 0x167   :  { %v2921_v16 = vand.u32 4294901760, %v690_v42 }
 0x168   :  { %v2349_v56 = vpop.eup %2348 }
 0x169   :  { %v2924_v61 = vsub.f32 %v690_v42, %v2921_v16  ;;  %v691_v45 = vmul.f32 %v2349_v56, %v662_v63  ;;  %1875 = vmatmul.mubr.f32.vlgmr.msra.gmra.mrb[0].mxu1 %v2921_v16 }
 0x16a   :  { %2169 = vmatpush3.bf16.msra.mxu1 %v2168_v37  ;;  %1877 = vmatprep.mubr.msk.f32.mxu1 %vm2392_vm0, %v2393_v1 }
 0x16b   :  { %v792_v19 = vand.u32 4294901760, %v2924_v61  ;;  %v2930_v62 = vand.u32 4294901760, %v691_v45  ;;  %2170 = vmatprep.subr.bf16.mxu1 %v2391_v0 }
 0x16c   :  { %v2351_v57 = vpop.eup %2350 }
 0x16d   :  { %v793_v33 = vsub.f32 %v2924_v61, %v792_v19  ;;  %v2937_v3 = vsub.f32 %v691_v45, %v2930_v62  ;;  %v692_v63 = vmul.f32 %v2351_v57, %v668_v14  ;;  %1878 = vmatmul.mubr.f32.gmra.mrb[2].mxu1 %v2930_v62 }
 0x16e   :  { %2172 = vmatpush3.bf16.msra.mxu1 %v2171_v2  ;;  %1880 = vmatprep.mubr.msk.f32.mxu1 %vm2392_vm0, %v2393_v1 }
 0x16f   :  { %v794_v11 = vand.u32 4294901760, %v793_v33  ;;  %v2942_v28 = vand.u32 4294901760, %v692_v63  ;;  %2173 = vmatprep.subr.bf16.mxu1 %v2391_v0  ;;  %v802_v8 = vand.u32 4294901760, %v2937_v3 }
 0x171   :  { %v2947_v42 = vsub.f32 %v692_v63, %v2942_v28  ;;  %1834 = vmatmul.mubr.f32.vlgmr.msra.gmra.mrb[6].mxu0 %v794_v11  ;;  %1881 = vmatmul.mubr.f32.gmra.mrb[4].mxu1 %v2942_v28  ;;  %v803_v2 = vsub.f32 %v2937_v3, %v802_v8 }
 0x172   :  { %2175 = vmatpush3.bf16.msra.mxu1 %v2174_v9  ;;  %2241 = vmatpush3.bf16.msra.mxu0 %v2761_v36 }
 0x173   :  { %1836 = vmatprep.mubr.msk.f32.mxu0 %vm2392_vm0, %v2393_v1  ;;  %2176 = vmatprep.subr.bf16.mxu1 %v2391_v0  ;;  %v804_v14 = vand.u32 4294901760, %v803_v2  ;;  %v812_v37 = vand.u32 4294901760, %v2947_v42 }
 0x174   :  { %2242 = vmatprep.subr.bf16.mxu0 %v2391_v0  ;;  %1915 = vmatprep.mubr.msk.f32.mxu1 %vm2392_vm0, %v2393_v1 }
 0x175   :  { %1837 = vmatmul.mubr.f32.gmra.mrb[8].mxu0 %v804_v14  ;;  %v813_v9 = vsub.f32 %v2947_v42, %v812_v37 }
 0x176   :  { %2178 = vmatpush3.bf16.msra.mxu1 %v2177_v47  ;;  %2244 = vmatpush3.bf16.msra.mxu0 %v2796_v55  ;;  %v2216_v47 = vpack.c.bf16 %v830_v25, %v823_v24  ;;  %v2228_v24 = vpack.c.bf16 %v886_v43, %v879_v10  ;;  %v2231_v25 = vpack.c.bf16 %v900_v40, %v893_v21 }
 0x177   :  { %1839 = vmatprep.mubr.msk.f32.mxu0 %vm2392_vm0, %v2393_v1  ;;  %2179 = vmatprep.subr.bf16.mxu1 %v2391_v0  ;;  %v814_v56 = vand.u32 4294901760, %v813_v9 }
 0x178   :  { %2245 = vmatprep.subr.bf16.mxu0 %v2391_v0 }
 0x179   :  { %1840 = vmatmul.mubr.f32.gmra.mrb[10].mxu0 %v814_v56 }
 0x17a   :  { %2181 = vmatpush3.bf16.msra.mxu1 %v2180_v49  ;;  %2247 = vmatpush3.bf16.msra.mxu0 %v2829_v50  ;;  %v2219_v49 = vpack.c.bf16 %v844_v32, %v837_v31  ;;  %v2237_v31 = vpack.c.bf16 %v3121_v27, %v921_v46 }
 0x17b   :  { %2182 = vmatprep.subr.bf16.mxu1 %v2391_v0  ;;  %2248 = vmatprep.subr.bf16.mxu0 %v2391_v0 }
 0x17c   :  { %2038 = vmatprep.mubr.msk.f32.mxu0 %vm2392_vm0, %v2393_v1 }
 0x17e   :  { %2184 = vmatpush3.bf16.msra.mxu1 %v2183_v35  ;;  %2250 = vmatpush3.bf16.msra.mxu0 %v2856_v52 }
 0x17f   :  { %2185 = vmatprep.subr.bf16.mxu1 %v2391_v0  ;;  %2251 = vmatprep.subr.bf16.mxu0 %v2391_v0 }
 0x182   :  { %2187 = vmatpush3.bf16.msra.mxu1 %v2186_v48  ;;  %2253 = vmatpush3.bf16.msra.mxu0 %v2877_v17 }
 0x183   :  { %2188 = vmatprep.subr.bf16.mxu1 %v2391_v0  ;;  %2254 = vmatprep.subr.bf16.mxu0 %v2391_v0 }
 0x186   :  { %2190 = vmatpush3.bf16.msra.mxu1 %v2189_v30  ;;  %2256 = vmatpush3.bf16.msra.mxu0 %v2892_v7 }
 0x187   :  { %2191 = vmatprep.subr.bf16.mxu1 %v2391_v0  ;;  %2257 = vmatprep.subr.bf16.mxu0 %v2391_v0 }
 0x189   :  { %1916 = vmatmul.mubr.f32.vlgmr.msra.gmra.mrb[0].mxu1 %v2924_v61 }
 0x18a   :  { %2193 = vmatpush3.bf16.msra.mxu1 %v2761_v36  ;;  %2259 = vmatpush3.bf16.msra.mxu0 %v2897_v13 }
 0x18b   :  { %1918 = vmatprep.mubr.msk.f32.mxu1 %vm2392_vm0, %v2393_v1  ;;  %2194 = vmatprep.subr.bf16.mxu1 %v2391_v0 }
 0x18c   :  { %2260 = vmatprep.subr.bf16.mxu0 %v2391_v0 }
 0x18d   :  { %1919 = vmatmul.mubr.f32.gmra.mrb[2].mxu1 %v2937_v3 }
 0x18e   :  { %2196 = vmatpush3.bf16.msra.mxu1 %v2796_v55  ;;  %2262 = vmatpush3.bf16.msra.mxu0 %v2901_v18 }
 0x18f   :  { %1921 = vmatprep.mubr.msk.f32.mxu1 %vm2392_vm0, %v2393_v1  ;;  %2197 = vmatprep.subr.bf16.mxu1 %v2391_v0 }
 0x191   :  { %1922 = vmatmul.mubr.f32.gmra.mrb[4].mxu1 %v2947_v42  ;;  %2039 = vmatmul.mubr.f32.vlgmr.msra.gmra.mrb[12].mxu0 %v2921_v16 }
 0x192   :  { %2199 = vmatpush3.bf16.msra.mxu1 %v2829_v50  ;;  %2041 = vmatprep.mubr.msk.f32.mxu0 %vm2392_vm0, %v2393_v1 }
 0x193   :  { %2200 = vmatprep.subr.bf16.mxu1 %v2391_v0  ;;  %1956 = vmatprep.mubr.msk.f32.mxu1 %vm2392_vm0, %v2393_v1 }
 0x195   :  { %2042 = vmatmul.mubr.f32.gmra.mrb[14].mxu0 %v2930_v62 }
 0x196   :  { %2202 = vmatpush3.bf16.msra.mxu1 %v2856_v52 }
 0x197   :  { %2203 = vmatprep.subr.bf16.mxu1 %v2391_v0 }
 0x19a   :  { %2205 = vmatpush3.bf16.msra.mxu1 %v2877_v17 }
 0x19b   :  { %2206 = vmatprep.subr.bf16.mxu1 %v2391_v0 }
 0x19e   :  { %2208 = vmatpush3.bf16.msra.mxu1 %v2892_v7 }
 0x19f   :  { %2209 = vmatprep.subr.bf16.mxu1 %v2391_v0 }
 0x1a2   :  { %2211 = vmatpush3.bf16.msra.mxu1 %v2897_v13 }
 0x1a3   :  { %2212 = vmatprep.subr.bf16.mxu1 %v2391_v0 }
 0x1a6   :  { %2214 = vmatpush3.bf16.msra.mxu1 %v2901_v18 }
 0x1a7   :  { %2215 = vmatprep.subr.bf16.mxu1 %v2391_v0 }
 0x1a9   :  { %1957 = vmatmul.mubr.f32.vlgmr.msra.gmra.mrb[0].mxu1 %v792_v19 }
 0x1aa   :  { %2217 = vmatpush3.bf16.msra.mxu1 %v2216_v47  ;;  %1959 = vmatprep.mubr.msk.f32.mxu1 %vm2392_vm0, %v2393_v1 }
 0x1ab   :  { %2218 = vmatprep.subr.bf16.mxu1 %v2391_v0 }
 0x1ad   :  { %1960 = vmatmul.mubr.f32.gmra.mrb[2].mxu1 %v802_v8 }
 0x1ae   :  { %2220 = vmatpush3.bf16.msra.mxu1 %v2219_v49  ;;  %1962 = vmatprep.mubr.msk.f32.mxu1 %vm2392_vm0, %v2393_v1 }
 0x1af   :  { %2221 = vmatprep.subr.bf16.mxu1 %v2391_v0 }
 0x1b1   :  { %1963 = vmatmul.mubr.f32.gmra.mrb[4].mxu1 %v812_v37 }
 0x1b2   :  { %2223 = vmatpush3.bf16.msra.mxu1 %v2222_v22  ;;  %1997 = vmatprep.mubr.msk.f32.mxu1 %vm2392_vm0, %v2393_v1 }
 0x1b3   :  { %2224 = vmatprep.subr.bf16.mxu1 %v2391_v0 }
 0x1b6   :  { %2226 = vmatpush3.bf16.msra.mxu1 %v2225_v23 }
 0x1b7   :  { %2227 = vmatprep.subr.bf16.mxu1 %v2391_v0 }
 0x1ba   :  { %2229 = vmatpush3.bf16.msra.mxu1 %v2228_v24 }
 0x1bb   :  { %2230 = vmatprep.subr.bf16.mxu1 %v2391_v0 }
 0x1be   :  { %2232 = vmatpush3.bf16.msra.mxu1 %v2231_v25 }
 0x1bf   :  { %2233 = vmatprep.subr.bf16.mxu1 %v2391_v0 }
 0x1c2   :  { %2235 = vmatpush3.bf16.msra.mxu1 %v2234_v26 }
 0x1c3   :  { %2236 = vmatprep.subr.bf16.mxu1 %v2391_v0 }
 0x1c6   :  { %2238 = vmatpush3.bf16.msra.mxu1 %v2237_v31 }
 0x1c7   :  { %2263 = vmatprep.subr.bf16.mxu1 %v2391_v0 }
 0x1c9   :  { %1998 = vmatmul.mubr.f32.vlgmr.msra.gmra.mrb[0].mxu1 %v2921_v16 }
 0x1ca   :  { %2271 = vmatpush3.bf16.msra.mxu1 %v2761_v36  ;;  %2000 = vmatprep.mubr.msk.f32.mxu1 %vm2392_vm0, %v2393_v1 }
 0x1cb   :  { %2264 = vmatprep.subr.bf16.mxu1 %v2391_v0 }
 0x1cd   :  { %2001 = vmatmul.mubr.f32.gmra.mrb[2].mxu1 %v2930_v62 }
 0x1ce   :  { %2272 = vmatpush3.bf16.msra.mxu1 %v2796_v55  ;;  %2003 = vmatprep.mubr.msk.f32.mxu1 %vm2392_vm0, %v2393_v1 }
 0x1cf   :  { %2265 = vmatprep.subr.bf16.mxu1 %v2391_v0 }
 0x1d1   :  { %2004 = vmatmul.mubr.f32.gmra.mrb[4].mxu1 %v2942_v28 }
 0x1d2   :  { %2273 = vmatpush3.bf16.msra.mxu1 %v2829_v50  ;;  %2044 = vmatprep.mubr.msk.f32.mxu1 %vm2392_vm0, %v2393_v1 }
 0x1d3   :  { %2266 = vmatprep.subr.bf16.mxu1 %v2391_v0 }
 0x1d6   :  { %2274 = vmatpush3.bf16.msra.mxu1 %v2856_v52 }
 0x1d7   :  { %2267 = vmatprep.subr.bf16.mxu1 %v2391_v0 }
 0x1da   :  { %2275 = vmatpush3.bf16.msra.mxu1 %v2877_v17 }
 0x1db   :  { %2268 = vmatprep.subr.bf16.mxu1 %v2391_v0 }
 0x1de   :  { %2276 = vmatpush3.bf16.msra.mxu1 %v2892_v7 }
 0x1df   :  { %2269 = vmatprep.subr.bf16.mxu1 %v2391_v0 }
 0x1e2   :  { %2277 = vmatpush3.bf16.msra.mxu1 %v2897_v13 }
 0x1e3   :  { %2270 = vmatprep.subr.bf16.mxu1 %v2391_v0 }
 0x1e6   :  { %2278 = vmatpush3.bf16.msra.mxu1 %v2901_v18 }
 0x1e9   :  { %2045 = vmatmul.mubr.f32.vlgmr.msra.gmra.mrb[4].mxu1 %v2942_v28 }
 0x244   :  { %v796_v1 = vpop.f32.mrb[6].mxu0 }
 0x245   :  { %v1835_v32 = vpop.f32.mrb[7].mxu0 }
 0x248   :  { %v806_v41 = vpop.f32.mrb[8].mxu0 }
 0x249   :  { %v1838_v44 = vpop.f32.mrb[9].mxu0 }
 0x24c   :  { %v816_v53 = vpop.f32.mrb[10].mxu0 }
 0x24d   :  { %v1841_v54 = vpop.f32.mrb[11].mxu0 }
 0x264   :  { %v1420_v5 = vpop.f32.mrb[12].mxu0 }
 0x265   :  { %v2040_v6 = vpop.f32.mrb[13].mxu0 }
 0x268   :  { %v1426_v20 = vpop.f32.mrb[14].mxu0 }
 0x269   :  { %v2043_v29 = vpop.f32.mrb[15].mxu0 }
 0x29c   :  { %v1321_v36 = vpop.f32.mrb[0].mxu1 }
 0x29d   :  { %v2279_v38 = vadd.f32 %v1321_v36, %v796_v1  ;;  %v1999_v39 = vpop.f32.mrb[1].mxu1 }
 0x29f   :  { %v2280_v10 = vadd.f32 %v2279_v38, %v1420_v5 }
 0x2a0   :  { %v1327_v43 = vpop.f32.mrb[2].mxu1 }
 0x2a1   :  { %v1468_v0 = vmul.f32 -1.442695, %v2280_v10  ;;  %v2281_v55 = vadd.f32 %v1327_v43, %v806_v41  ;;  %v2002_v59 = vpop.f32.mrb[3].mxu1 }
 0x2a3   :  { %2352 = vpow2.f32 %v1468_v0  ;;  %v2282_v15 = vadd.f32 %v2281_v55, %v1426_v20 }
 0x2a5   :  { %v1469_v21 = vmul.f32 -1.442695, %v2282_v15 }
 0x2a7   :  { %2354 = vpow2.f32 %v1469_v21 }
 0x2ad   :  { %v2353_v40 = vpop.eup %2352 }
 0x2ae   :  { %v1445_v50 = vadd.f32 1.0, %v2353_v40 }
 0x2b0   :  { %2356 = vrcp.f32 %v1445_v50 }
 0x2b1   :  { %v2355_v4 = vpop.eup %2354 }
 0x2b2   :  { %v1446_v12 = vadd.f32 1.0, %v2355_v4 }
 0x2b4   :  { %2358 = vrcp.f32 %v1446_v12 }
 0x2ba   :  { %v2357_v34 = vpop.eup %2356 }
 0x2bb   :  { %v1454_v51 = vmul.f32 %v2357_v34, %v2280_v10 }
 0x2bc   :  { %v1432_v52 = vpop.f32.mrb[4].mxu1 }
 0x2bd   :  { %1457 = vst [vmem:[%s3119_s3] sm:$0xff] %v1454_v51  ;;  %v2283_v58 = vadd.f32 %v1432_v52, %v816_v53  ;;  %v2046_v60 = vpop.f32.mrb[5].mxu1 }
 0x2be   :  { %v2359_v46 = vpop.eup %2358 }
 0x2bf   :  { %v1455_v17 = vmul.f32 %v2359_v46, %v2282_v15  ;;  %v1470_v7 = vmul.f32 -1.442695, %v2283_v58 }
 0x2c1   :  { %1458 = vst [vmem:[%s3119_s3 + $0x8] sm:$0xff] %v1455_v17  ;;  %2360 = vpow2.f32 %v1470_v7 }
 0x2cb   :  { %v2361_v13 = vpop.eup %2360 }
 0x2cc   :  { %v1447_v18 = vadd.f32 1.0, %v2361_v13 }
 0x2ce   :  { %2362 = vrcp.f32 %v1447_v18 }
 0x2d8   :  { %v2363_v35 = vpop.eup %2362 }
 0x2d9   :  { %v1456_v48 = vmul.f32 %v2363_v35, %v2283_v58 }
 0x2db   :  { %1459 = vst [vmem:[%s3119_s3 + $0x10] sm:$0xff] %v1456_v48 }
 0x2dc   :  { %1464 = vsyncpa [#allocation3], 1 }

// kernel: embed_coeffs.5
= control target key start
LH: loop header
LB: loop body
LE: loop exit
PB: predicated region body
PF: predicated region fallthrough
CT: control target
= control target key end

     0   :  { %vm34_vm0 = vcmask 261120   ;;  %v1028_v0 = vmov 0.0|0.0   ;;  %vm1029_vm1 = vmmov 0   ;;  %v1030_v8 = vmov 0.0   ;;  %s1286_s2 = inlined_call_operand.vmem [shape: f32[32,128], index: 2, kind: input, shape index: {}]   ;;  %s1287_s0 = inlined_call_operand.vmem [shape: f32[40,32], index: 0, kind: input, shape index: {}]   ;;  %s1288_s1 = inlined_call_operand.vmem [shape: f32[40,128], index: 1, kind: input, shape index: {}]   ;;  %s1289_s3 = inlined_call_operand.vmem [shape: f32[1,128], index: 3, kind: input, shape index: {}]   ;;  %s1290_s4 = inlined_call_operand.vmem [shape: f32[1,128], index: 4, kind: input, shape index: {}]   ;;  %s1291_s5 = inlined_call_operand.vmem [shape: f32[40,128], index: 5, kind: output, shape index: {}]  }
   0x1   :  { %939 = vmatprep.subr.bf16.mxu1 %v1028_v0  ;;  %957 = vmatprep.subr.bf16.mxu0 %v1028_v0  ;;  %v25_v1 = vld [vmem:[%s1286_s2] sm:$0xff]  ;;  %v26_v2 = vld [vmem:[%s1286_s2 + $0x8] sm:$0xff]  ;;  %v27_v3 = vld [vmem:[%s1286_s2 + $0x10] sm:$0xff] }
   0x2   :  { %v51_v4 = vand.u32 4294901760, %v25_v1  ;;  %v54_v5 = vand.u32 4294901760, %v26_v2  ;;  %v28_v6 = vld [vmem:[%s1286_s2 + $0x18] sm:$0xff]  ;;  %v57_v7 = vand.u32 4294901760, %v27_v3  ;;  %809 = vmatprep.mubr.msk.f32.mxu1 %vm1029_vm1, %v1030_v8  ;;  %878 = vmatprep.mubr.msk.f32.mxu0 %vm1029_vm1, %v1030_v8  ;;  %v20_v9 = vld [vmem:[%s1287_s0] sm:$0xff]  ;;  %v21_v10 = vld [vmem:[%s1287_s0 + $0x8] sm:$0xff] }
   0x3   :  { %v60_v11 = vand.u32 4294901760, %v28_v6  ;;  %v36_v12 = vsel %vm34_vm0, %v20_v9, 0  ;;  %v39_v13 = vsel %vm34_vm0, %v21_v10, 0  ;;  %v22_v14 = vld [vmem:[%s1287_s0 + $0x10] sm:$0xff]  ;;  %v23_v31 = vld [vmem:[%s1287_s0 + $0x18] sm:$0xff]  ;;  %v24_v39 = vld [vmem:[%s1287_s0 + $0x20] sm:$0xff] }
   0x4   :  { %v1090_v15 = vpack.c.bf16 %v54_v5, %v51_v4  ;;  %v1092_v16 = vsub.f32 %v25_v1, %v51_v4  ;;  %v1094_v17 = vsub.f32 %v26_v2, %v54_v5  ;;  %v1096_v18 = vsub.f32 %v27_v3, %v57_v7 }
   0x5   :  { %v1098_v19 = vpack.c.bf16 %v60_v11, %v57_v7  ;;  %v1100_v20 = vsub.f32 %v28_v6, %v60_v11  ;;  %v1102_v21 = vand.u32 4294901760, %v36_v12  ;;  %v1104_v22 = vand.u32 4294901760, %v39_v13  ;;  %v29_v11 = vld [vmem:[%s1288_s1] sm:$0xff] }
   0x6   :  { %941 = vmatpush3.bf16.msra.mxu1 %v1090_v15  ;;  %959 = vmatpush3.bf16.msra.mxu0 %v1090_v15  ;;  %v172_v23 = vand.u32 4294901760, %v1092_v16  ;;  %v179_v24 = vand.u32 4294901760, %v1094_v17  ;;  %v42_v25 = vsel %vm34_vm0, %v22_v14, 0  ;;  %v186_v26 = vand.u32 4294901760, %v1096_v18 }
   0x7   :  { %942 = vmatprep.subr.bf16.mxu1 %v1028_v0  ;;  %960 = vmatprep.subr.bf16.mxu0 %v1028_v0  ;;  %v1115_v27 = vsub.f32 %v36_v12, %v1102_v21  ;;  %v1118_v28 = vsub.f32 %v39_v13, %v1104_v22  ;;  %v1120_v29 = vand.u32 4294901760, %v42_v25  ;;  %v193_v30 = vand.u32 4294901760, %v1100_v20 }
   0x8   :  { %v173_v32 = vsub.f32 %v1092_v16, %v172_v23  ;;  %v180_v33 = vsub.f32 %v1094_v17, %v179_v24  ;;  %v187_v34 = vsub.f32 %v1096_v18, %v186_v26  ;;  %v964_v42 = vpack.c.bf16 %v179_v24, %v172_v23 }
   0x9   :  { %v121_v35 = vand.u32 4294901760, %v1115_v27  ;;  %v131_v36 = vand.u32 4294901760, %v1118_v28  ;;  %v1132_v37 = vsub.f32 %v42_v25, %v1120_v29  ;;  %v194_v38 = vsub.f32 %v1100_v20, %v193_v30 }
   0xa   :  { %944 = vmatpush3.bf16.msra.mxu1 %v1098_v19  ;;  %962 = vmatpush3.bf16.msra.mxu0 %v1098_v19  ;;  %v174_v40 = vand.u32 4294901760, %v173_v32  ;;  %v181_v41 = vand.u32 4294901760, %v180_v33  ;;  %v45_v43 = vsel %vm34_vm0, %v23_v31, 0  ;;  %v188_v47 = vand.u32 4294901760, %v187_v34 }
   0xb   :  { %v122_v44 = vsub.f32 %v1115_v27, %v121_v35  ;;  %945 = vmatprep.subr.bf16.mxu1 %v1028_v0  ;;  %963 = vmatprep.subr.bf16.mxu0 %v1028_v0  ;;  %v132_v45 = vsub.f32 %v1118_v28, %v131_v36  ;;  %v141_v46 = vand.u32 4294901760, %v1132_v37  ;;  %v195_v49 = vand.u32 4294901760, %v194_v38 }
   0xc   :  { %v946_v48 = vpack.c.bf16 %v181_v41, %v174_v40  ;;  %v1146_v50 = vand.u32 4294901760, %v45_v43  ;;  %v48_v51 = vsel %vm34_vm0, %v24_v39, 0  ;;  %v967_v54 = vpack.c.bf16 %v193_v30, %v186_v26  ;;  %v31_v30 = vld [vmem:[%s1288_s1 + $0x10] sm:$0xff]  ;;  %v32_v40 = vld [vmem:[%s1288_s1 + $0x18] sm:$0xff] }
   0xd   :  { %v123_v52 = vand.u32 4294901760, %v122_v44  ;;  %879 = vmatmul.mubr.f32.vlgmr.msra.gmra.mrb[0].mxu0 %v121_v35  ;;  %v1154_v55 = vand.u32 4294901760, %v48_v51  ;;  %v133_v56 = vand.u32 4294901760, %v132_v45  ;;  %v142_v57 = vsub.f32 %v1132_v37, %v141_v46 }
   0xe   :  { %881 = vmatprep.mubr.msk.f32.mxu0 %vm1029_vm1, %v1030_v8  ;;  %965 = vmatpush3.bf16.msra.mxu0 %v964_v42  ;;  %v1152_v53 = vsub.f32 %v45_v43, %v1146_v50  ;;  %v949_v58 = vpack.c.bf16 %v195_v49, %v188_v47  ;;  %v952_v4 = vpack.c.bf16 %v1094_v17, %v1092_v16 }
   0xf   :  { %810 = vmatmul.mubr.f32.vlgmr.msra.gmra.mrb[0].mxu1 %v123_v52  ;;  %966 = vmatprep.subr.bf16.mxu0 %v1028_v0  ;;  %v1162_v60 = vsub.f32 %v48_v51, %v1154_v55  ;;  %v143_v61 = vand.u32 4294901760, %v142_v57  ;;  %v955_v5 = vpack.c.bf16 %v1100_v20, %v1096_v18  ;;  %v30_v20 = vld [vmem:[%s1288_s1 + $0x8] sm:$0xff] }
  0x10   :  { %947 = vmatpush3.bf16.msra.mxu1 %v946_v48  ;;  %812 = vmatprep.mubr.msk.f32.mxu1 %vm1029_vm1, %v1030_v8  ;;  %v151_v59 = vand.u32 4294901760, %v1152_v53 }
  0x11   :  { %882 = vmatmul.mubr.f32.gmra.mrb[2].mxu0 %v131_v36  ;;  %948 = vmatprep.subr.bf16.mxu1 %v1028_v0  ;;  %v161_v63 = vand.u32 4294901760, %v1162_v60 }
  0x12   :  { %884 = vmatprep.mubr.msk.f32.mxu0 %vm1029_vm1, %v1030_v8  ;;  %968 = vmatpush3.bf16.msra.mxu0 %v967_v54  ;;  %v152_v62 = vsub.f32 %v1152_v53, %v151_v59 }
  0x13   :  { %813 = vmatmul.mubr.f32.gmra.mrb[2].mxu1 %v133_v56  ;;  %969 = vmatprep.subr.bf16.mxu0 %v1028_v0  ;;  %v162_v2 = vsub.f32 %v1162_v60, %v161_v63 }
  0x14   :  { %815 = vmatprep.mubr.msk.f32.mxu1 %vm1029_vm1, %v1030_v8  ;;  %950 = vmatpush3.bf16.msra.mxu1 %v949_v58  ;;  %v153_v1 = vand.u32 4294901760, %v152_v62 }
  0x15   :  { %885 = vmatmul.mubr.f32.gmra.mrb[4].mxu0 %v141_v46  ;;  %951 = vmatprep.subr.bf16.mxu1 %v1028_v0  ;;  %v163_v3 = vand.u32 4294901760, %v162_v2 }
  0x16   :  { %887 = vmatprep.mubr.msk.f32.mxu0 %vm1029_vm1, %v1030_v8 }
  0x17   :  { %816 = vmatmul.mubr.f32.gmra.mrb[4].mxu1 %v143_v61 }
  0x18   :  { %818 = vmatprep.mubr.msk.f32.mxu1 %vm1029_vm1, %v1030_v8 }
  0x19   :  { %888 = vmatmul.mubr.f32.gmra.mrb[6].mxu0 %v151_v59 }
  0x1a   :  { %890 = vmatprep.mubr.msk.f32.mxu0 %vm1029_vm1, %v1030_v8 }
  0x1b   :  { %819 = vmatmul.mubr.f32.gmra.mrb[6].mxu1 %v153_v1 }
  0x1c   :  { %821 = vmatprep.mubr.msk.f32.mxu1 %vm1029_vm1, %v1030_v8 }
  0x1d   :  { %891 = vmatmul.mubr.f32.gmra.mrb[8].mxu0 %v161_v63 }
  0x1e   :  { %901 = vmatprep.mubr.msk.f32.mxu0 %vm1029_vm1, %v1030_v8 }
  0x1f   :  { %822 = vmatmul.mubr.f32.gmra.mrb[8].mxu1 %v163_v3 }
  0x20   :  { %832 = vmatprep.mubr.msk.f32.mxu1 %vm1029_vm1, %v1030_v8 }
  0x21   :  { %902 = vmatmul.mubr.f32.vlgmr.msra.gmra.mrb[0].mxu0 %v1102_v21 }
  0x22   :  { %904 = vmatprep.mubr.msk.f32.mxu0 %vm1029_vm1, %v1030_v8  ;;  %971 = vmatpush3.bf16.msra.mxu0 %v1090_v15 }
  0x23   :  { %833 = vmatmul.mubr.f32.vlgmr.msra.gmra.mrb[0].mxu1 %v1102_v21  ;;  %972 = vmatprep.subr.bf16.mxu0 %v1028_v0 }
  0x24   :  { %953 = vmatpush3.bf16.msra.mxu1 %v952_v4  ;;  %835 = vmatprep.mubr.msk.f32.mxu1 %vm1029_vm1, %v1030_v8 }
  0x25   :  { %905 = vmatmul.mubr.f32.gmra.mrb[2].mxu0 %v1104_v22  ;;  %954 = vmatprep.subr.bf16.mxu1 %v1028_v0 }
  0x26   :  { %907 = vmatprep.mubr.msk.f32.mxu0 %vm1029_vm1, %v1030_v8  ;;  %974 = vmatpush3.bf16.msra.mxu0 %v1098_v19  ;;  %v746_v19 = vld [vmem:[%s1290_s4] ss:$0 sm:$0xff] }
  0x27   :  { %836 = vmatmul.mubr.f32.gmra.mrb[2].mxu1 %v1104_v22 }
  0x28   :  { %838 = vmatprep.mubr.msk.f32.mxu1 %vm1029_vm1, %v1030_v8  ;;  %956 = vmatpush3.bf16.msra.mxu1 %v955_v5 }
  0x29   :  { %908 = vmatmul.mubr.f32.gmra.mrb[4].mxu0 %v1120_v29 }
  0x2a   :  { %910 = vmatprep.mubr.msk.f32.mxu0 %vm1029_vm1, %v1030_v8 }
  0x2b   :  { %839 = vmatmul.mubr.f32.gmra.mrb[4].mxu1 %v1120_v29 }
  0x2c   :  { %841 = vmatprep.mubr.msk.f32.mxu1 %vm1029_vm1, %v1030_v8 }
  0x2d   :  { %911 = vmatmul.mubr.f32.gmra.mrb[6].mxu0 %v1146_v50 }
  0x2e   :  { %913 = vmatprep.mubr.msk.f32.mxu0 %vm1029_vm1, %v1030_v8 }
  0x2f   :  { %842 = vmatmul.mubr.f32.gmra.mrb[6].mxu1 %v1146_v50 }
  0x30   :  { %844 = vmatprep.mubr.msk.f32.mxu1 %vm1029_vm1, %v1030_v8 }
  0x31   :  { %914 = vmatmul.mubr.f32.gmra.mrb[8].mxu0 %v1154_v55 }
  0x32   :  { %924 = vmatprep.mubr.msk.f32.mxu0 %vm1029_vm1, %v1030_v8 }
  0x33   :  { %845 = vmatmul.mubr.f32.gmra.mrb[8].mxu1 %v1154_v55 }
  0x34   :  { %855 = vmatprep.mubr.msk.f32.mxu1 %vm1029_vm1, %v1030_v8 }
  0x35   :  { %925 = vmatmul.mubr.f32.vlgmr.msra.gmra.mrb[0].mxu0 %v1102_v21 }
  0x36   :  { %927 = vmatprep.mubr.msk.f32.mxu0 %vm1029_vm1, %v1030_v8 }
  0x37   :  { %856 = vmatmul.mubr.f32.vlgmr.msra.gmra.mrb[0].mxu1 %v1115_v27 }
  0x38   :  { %858 = vmatprep.mubr.msk.f32.mxu1 %vm1029_vm1, %v1030_v8 }
  0x39   :  { %928 = vmatmul.mubr.f32.gmra.mrb[2].mxu0 %v1104_v22 }
  0x3a   :  { %930 = vmatprep.mubr.msk.f32.mxu0 %vm1029_vm1, %v1030_v8 }
  0x3b   :  { %859 = vmatmul.mubr.f32.gmra.mrb[2].mxu1 %v1118_v28 }
  0x3c   :  { %861 = vmatprep.mubr.msk.f32.mxu1 %vm1029_vm1, %v1030_v8 }
  0x3d   :  { %931 = vmatmul.mubr.f32.gmra.mrb[4].mxu0 %v1120_v29 }
  0x3e   :  { %933 = vmatprep.mubr.msk.f32.mxu0 %vm1029_vm1, %v1030_v8 }
  0x3f   :  { %862 = vmatmul.mubr.f32.gmra.mrb[4].mxu1 %v1132_v37 }
  0x40   :  { %864 = vmatprep.mubr.msk.f32.mxu1 %vm1029_vm1, %v1030_v8 }
  0x41   :  { %934 = vmatmul.mubr.f32.gmra.mrb[6].mxu0 %v1146_v50  ;;  %v33_v50 = vld [vmem:[%s1288_s1 + $0x20] sm:$0xff] }
  0x42   :  { %936 = vmatprep.mubr.msk.f32.mxu0 %vm1029_vm1, %v1030_v8 }
  0x43   :  { %865 = vmatmul.mubr.f32.gmra.mrb[6].mxu1 %v1152_v53 }
  0x44   :  { %867 = vmatprep.mubr.msk.f32.mxu1 %vm1029_vm1, %v1030_v8  ;;  %v745_v8 = vld [vmem:[%s1289_s3] ss:$0 sm:$0xff] }
  0x45   :  { %937 = vmatmul.mubr.f32.gmra.mrb[8].mxu0 %v1154_v55 }
  0x47   :  { %868 = vmatmul.mubr.f32.gmra.mrb[8].mxu1 %v1162_v60 }
 0x108   :  { %v679_v0 = vpop.f32.mrb[0].mxu0 }
 0x109   :  { %v926_v6 = vpop.f32.mrb[1].mxu0 }
 0x10a   :  { %v360_v7 = vpop.f32.mrb[0].mxu1 }
 0x10b   :  { %v975_v9 = vadd.f32 1.0, %v360_v7  ;;  %v857_v10 = vpop.f32.mrb[1].mxu1 }
 0x10c   :  { %v685_v12 = vpop.f32.mrb[2].mxu0 }
 0x10d   :  { %v976_v13 = vadd.f32 %v975_v9, %v679_v0  ;;  %v929_v14 = vpop.f32.mrb[3].mxu0 }
 0x10e   :  { %v367_v15 = vpop.f32.mrb[2].mxu1 }
 0x10f   :  { %v707_v16 = vmul.f32 %v976_v13, %v29_v11  ;;  %v977_v17 = vadd.f32 1.0, %v367_v15  ;;  %v860_v18 = vpop.f32.mrb[3].mxu1 }
 0x110   :  { %v691_v21 = vpop.f32.mrb[4].mxu0 }
 0x111   :  { %v719_v22 = vmul.f32 %v745_v8, %v707_v16  ;;  %v978_v23 = vadd.f32 %v977_v17, %v685_v12  ;;  %v932_v24 = vpop.f32.mrb[5].mxu0 }
 0x112   :  { %v374_v25 = vpop.f32.mrb[4].mxu1 }
 0x113   :  { %v731_v26 = vadd.f32 %v746_v19, %v719_v22  ;;  %v708_v27 = vmul.f32 %v978_v23, %v30_v20  ;;  %v979_v28 = vadd.f32 1.0, %v374_v25  ;;  %v863_v29 = vpop.f32.mrb[5].mxu1 }
 0x114   :  { %v697_v31 = vpop.f32.mrb[6].mxu0 }
 0x115   :  { %736 = vst [vmem:[%s1291_s5] sm:$0xff] %v731_v26  ;;  %v720_v32 = vmul.f32 %v745_v8, %v708_v27  ;;  %v980_v33 = vadd.f32 %v979_v28, %v691_v21  ;;  %v935_v34 = vpop.f32.mrb[7].mxu0 }
 0x116   :  { %v381_v35 = vpop.f32.mrb[6].mxu1 }
 0x117   :  { %v732_v36 = vadd.f32 %v746_v19, %v720_v32  ;;  %v709_v37 = vmul.f32 %v980_v33, %v31_v30  ;;  %v981_v38 = vadd.f32 1.0, %v381_v35  ;;  %v866_v39 = vpop.f32.mrb[7].mxu1 }
 0x118   :  { %v703_v41 = vpop.f32.mrb[8].mxu0 }
 0x119   :  { %737 = vst [vmem:[%s1291_s5 + $0x8] sm:$0xff] %v732_v36  ;;  %v721_v42 = vmul.f32 %v745_v8, %v709_v37  ;;  %v982_v43 = vadd.f32 %v981_v38, %v697_v31  ;;  %v938_v44 = vpop.f32.mrb[9].mxu0 }
 0x11a   :  { %v388_v45 = vpop.f32.mrb[8].mxu1 }
 0x11b   :  { %v733_v46 = vadd.f32 %v746_v19, %v721_v42  ;;  %v710_v47 = vmul.f32 %v982_v43, %v32_v40  ;;  %v983_v48 = vadd.f32 1.0, %v388_v45  ;;  %v869_v49 = vpop.f32.mrb[9].mxu1 }
 0x11d   :  { %738 = vst [vmem:[%s1291_s5 + $0x10] sm:$0xff] %v733_v46  ;;  %v722_v51 = vmul.f32 %v745_v8, %v710_v47  ;;  %v984_v52 = vadd.f32 %v983_v48, %v703_v41 }
 0x11f   :  { %v734_v53 = vadd.f32 %v746_v19, %v722_v51  ;;  %v711_v54 = vmul.f32 %v984_v52, %v33_v50 }
 0x121   :  { %739 = vst [vmem:[%s1291_s5 + $0x18] sm:$0xff] %v734_v53  ;;  %v723_v55 = vmul.f32 %v745_v8, %v711_v54 }
 0x123   :  { %v735_v56 = vadd.f32 %v746_v19, %v723_v55 }
 0x125   :  { %740 = vst [vmem:[%s1291_s5 + $0x20] sm:$0xff] %v735_v56 }

// kernel: embed_coeffs.4
= control target key start
LH: loop header
LB: loop body
LE: loop exit
PB: predicated region body
PF: predicated region fallthrough
CT: control target
= control target key end

     0   :  { %vm28_vm0 = vcmask 261120   ;;  %v1071_v0 = vmov 0.0|0.0   ;;  %vm1072_vm1 = vmmov 0   ;;  %v1073_v8 = vmov 0.0   ;;  %s1301_s2 = inlined_call_operand.vmem [shape: f32[32,128], index: 2, kind: input, shape index: {}]   ;;  %s1302_s0 = inlined_call_operand.vmem [shape: f32[40,32], index: 0, kind: input, shape index: {}]   ;;  %s1303_s1 = inlined_call_operand.vmem [shape: f32[40,128], index: 1, kind: input, shape index: {}]   ;;  %s1304_s3 = inlined_call_operand.vmem [shape: f32[1,3,128], index: 3, kind: output, shape index: {}]  }
   0x1   :  { %982 = vmatprep.subr.bf16.mxu1 %v1071_v0  ;;  %1000 = vmatprep.subr.bf16.mxu0 %v1071_v0  ;;  %v19_v1 = vld [vmem:[%s1301_s2] sm:$0xff]  ;;  %v20_v2 = vld [vmem:[%s1301_s2 + $0x8] sm:$0xff]  ;;  %v21_v3 = vld [vmem:[%s1301_s2 + $0x10] sm:$0xff]  ;;  %vm781_vm2 = vcmask 1040384   ;;  %vm783_vm3 = vcmask 1041408  }
   0x2   :  { %v45_v4 = vand.u32 4294901760, %v19_v1  ;;  %v48_v5 = vand.u32 4294901760, %v20_v2  ;;  %v22_v6 = vld [vmem:[%s1301_s2 + $0x18] sm:$0xff]  ;;  %v51_v7 = vand.u32 4294901760, %v21_v3  ;;  %852 = vmatprep.mubr.msk.f32.mxu1 %vm1072_vm1, %v1073_v8  ;;  %921 = vmatprep.mubr.msk.f32.mxu0 %vm1072_vm1, %v1073_v8  ;;  %v14_v9 = vld [vmem:[%s1302_s0] sm:$0xff]  ;;  %v15_v10 = vld [vmem:[%s1302_s0 + $0x8] sm:$0xff] }
   0x3   :  { %v54_v11 = vand.u32 4294901760, %v22_v6  ;;  %v30_v12 = vsel %vm28_vm0, %v14_v9, 0  ;;  %v33_v13 = vsel %vm28_vm0, %v15_v10, 0  ;;  %v16_v14 = vld [vmem:[%s1302_s0 + $0x10] sm:$0xff]  ;;  %v17_v31 = vld [vmem:[%s1302_s0 + $0x18] sm:$0xff]  ;;  %v18_v39 = vld [vmem:[%s1302_s0 + $0x20] sm:$0xff] }
   0x4   :  { %v1123_v15 = vpack.c.bf16 %v48_v5, %v45_v4  ;;  %v1125_v16 = vsub.f32 %v19_v1, %v45_v4  ;;  %v1127_v17 = vsub.f32 %v20_v2, %v48_v5  ;;  %v1129_v18 = vsub.f32 %v21_v3, %v51_v7 }
   0x5   :  { %v1131_v19 = vpack.c.bf16 %v54_v11, %v51_v7  ;;  %v1133_v20 = vsub.f32 %v22_v6, %v54_v11  ;;  %v1135_v21 = vand.u32 4294901760, %v30_v12  ;;  %v1137_v22 = vand.u32 4294901760, %v33_v13 }
   0x6   :  { %984 = vmatpush3.bf16.msra.mxu1 %v1123_v15  ;;  %1002 = vmatpush3.bf16.msra.mxu0 %v1123_v15  ;;  %v166_v23 = vand.u32 4294901760, %v1125_v16  ;;  %v173_v24 = vand.u32 4294901760, %v1127_v17  ;;  %v36_v25 = vsel %vm28_vm0, %v16_v14, 0  ;;  %v180_v26 = vand.u32 4294901760, %v1129_v18 }
   0x7   :  { %985 = vmatprep.subr.bf16.mxu1 %v1071_v0  ;;  %1003 = vmatprep.subr.bf16.mxu0 %v1071_v0  ;;  %v1148_v27 = vsub.f32 %v30_v12, %v1135_v21  ;;  %v1151_v28 = vsub.f32 %v33_v13, %v1137_v22  ;;  %v1153_v29 = vand.u32 4294901760, %v36_v25  ;;  %v187_v30 = vand.u32 4294901760, %v1133_v20 }
   0x8   :  { %v167_v32 = vsub.f32 %v1125_v16, %v166_v23  ;;  %v174_v33 = vsub.f32 %v1127_v17, %v173_v24  ;;  %v181_v34 = vsub.f32 %v1129_v18, %v180_v26  ;;  %v1007_v42 = vpack.c.bf16 %v173_v24, %v166_v23 }
   0x9   :  { %v115_v35 = vand.u32 4294901760, %v1148_v27  ;;  %v125_v36 = vand.u32 4294901760, %v1151_v28  ;;  %v1165_v37 = vsub.f32 %v36_v25, %v1153_v29  ;;  %v188_v38 = vsub.f32 %v1133_v20, %v187_v30 }
   0xa   :  { %987 = vmatpush3.bf16.msra.mxu1 %v1131_v19  ;;  %1005 = vmatpush3.bf16.msra.mxu0 %v1131_v19  ;;  %v168_v40 = vand.u32 4294901760, %v167_v32  ;;  %v175_v41 = vand.u32 4294901760, %v174_v33  ;;  %v39_v43 = vsel %vm28_vm0, %v17_v31, 0  ;;  %v182_v47 = vand.u32 4294901760, %v181_v34 }
   0xb   :  { %v116_v44 = vsub.f32 %v1148_v27, %v115_v35  ;;  %988 = vmatprep.subr.bf16.mxu1 %v1071_v0  ;;  %1006 = vmatprep.subr.bf16.mxu0 %v1071_v0  ;;  %v126_v45 = vsub.f32 %v1151_v28, %v125_v36  ;;  %v135_v46 = vand.u32 4294901760, %v1165_v37  ;;  %v189_v49 = vand.u32 4294901760, %v188_v38 }
   0xc   :  { %v989_v48 = vpack.c.bf16 %v175_v41, %v168_v40  ;;  %v1179_v50 = vand.u32 4294901760, %v39_v43  ;;  %v42_v51 = vsel %vm28_vm0, %v18_v39, 0  ;;  %v1010_v54 = vpack.c.bf16 %v187_v30, %v180_v26  ;;  %v25_v26 = vld [vmem:[%s1303_s1 + $0x10] sm:$0xff] }
   0xd   :  { %v117_v52 = vand.u32 4294901760, %v116_v44  ;;  %922 = vmatmul.mubr.f32.vlgmr.msra.gmra.mrb[0].mxu0 %v115_v35  ;;  %v1187_v55 = vand.u32 4294901760, %v42_v51  ;;  %v127_v56 = vand.u32 4294901760, %v126_v45  ;;  %v136_v57 = vsub.f32 %v1165_v37, %v135_v46  ;;  %v26_v35 = vld [vmem:[%s1303_s1 + $0x18] sm:$0xff]  ;;  %v27_v44 = vld [vmem:[%s1303_s1 + $0x20] sm:$0xff] }
   0xe   :  { %924 = vmatprep.mubr.msk.f32.mxu0 %vm1072_vm1, %v1073_v8  ;;  %1008 = vmatpush3.bf16.msra.mxu0 %v1007_v42  ;;  %v1185_v53 = vsub.f32 %v39_v43, %v1179_v50  ;;  %v992_v58 = vpack.c.bf16 %v189_v49, %v182_v47  ;;  %v995_v4 = vpack.c.bf16 %v1127_v17, %v1125_v16  ;;  %v23_v17 = vld [vmem:[%s1303_s1] sm:$0xff] }
   0xf   :  { %853 = vmatmul.mubr.f32.vlgmr.msra.gmra.mrb[0].mxu1 %v117_v52  ;;  %1009 = vmatprep.subr.bf16.mxu0 %v1071_v0  ;;  %v1195_v60 = vsub.f32 %v42_v51, %v1187_v55  ;;  %v137_v61 = vand.u32 4294901760, %v136_v57  ;;  %v998_v5 = vpack.c.bf16 %v1133_v20, %v1129_v18 }
  0x10   :  { %990 = vmatpush3.bf16.msra.mxu1 %v989_v48  ;;  %855 = vmatprep.mubr.msk.f32.mxu1 %vm1072_vm1, %v1073_v8  ;;  %v145_v59 = vand.u32 4294901760, %v1185_v53 }
  0x11   :  { %925 = vmatmul.mubr.f32.gmra.mrb[2].mxu0 %v125_v36  ;;  %991 = vmatprep.subr.bf16.mxu1 %v1071_v0  ;;  %v155_v63 = vand.u32 4294901760, %v1195_v60 }
  0x12   :  { %927 = vmatprep.mubr.msk.f32.mxu0 %vm1072_vm1, %v1073_v8  ;;  %1011 = vmatpush3.bf16.msra.mxu0 %v1010_v54  ;;  %v146_v62 = vsub.f32 %v1185_v53, %v145_v59 }
  0x13   :  { %856 = vmatmul.mubr.f32.gmra.mrb[2].mxu1 %v127_v56  ;;  %1012 = vmatprep.subr.bf16.mxu0 %v1071_v0  ;;  %v156_v2 = vsub.f32 %v1195_v60, %v155_v63 }
  0x14   :  { %858 = vmatprep.mubr.msk.f32.mxu1 %vm1072_vm1, %v1073_v8  ;;  %993 = vmatpush3.bf16.msra.mxu1 %v992_v58  ;;  %v147_v1 = vand.u32 4294901760, %v146_v62 }
  0x15   :  { %928 = vmatmul.mubr.f32.gmra.mrb[4].mxu0 %v135_v46  ;;  %994 = vmatprep.subr.bf16.mxu1 %v1071_v0  ;;  %v157_v3 = vand.u32 4294901760, %v156_v2 }
  0x16   :  { %930 = vmatprep.mubr.msk.f32.mxu0 %vm1072_vm1, %v1073_v8 }
  0x17   :  { %859 = vmatmul.mubr.f32.gmra.mrb[4].mxu1 %v137_v61 }
  0x18   :  { %861 = vmatprep.mubr.msk.f32.mxu1 %vm1072_vm1, %v1073_v8 }
  0x19   :  { %931 = vmatmul.mubr.f32.gmra.mrb[6].mxu0 %v145_v59 }
  0x1a   :  { %933 = vmatprep.mubr.msk.f32.mxu0 %vm1072_vm1, %v1073_v8 }
  0x1b   :  { %862 = vmatmul.mubr.f32.gmra.mrb[6].mxu1 %v147_v1 }
  0x1c   :  { %864 = vmatprep.mubr.msk.f32.mxu1 %vm1072_vm1, %v1073_v8 }
  0x1d   :  { %934 = vmatmul.mubr.f32.gmra.mrb[8].mxu0 %v155_v63 }
  0x1e   :  { %944 = vmatprep.mubr.msk.f32.mxu0 %vm1072_vm1, %v1073_v8 }
  0x1f   :  { %865 = vmatmul.mubr.f32.gmra.mrb[8].mxu1 %v157_v3 }
  0x20   :  { %875 = vmatprep.mubr.msk.f32.mxu1 %vm1072_vm1, %v1073_v8 }
  0x21   :  { %945 = vmatmul.mubr.f32.vlgmr.msra.gmra.mrb[0].mxu0 %v1135_v21 }
  0x22   :  { %947 = vmatprep.mubr.msk.f32.mxu0 %vm1072_vm1, %v1073_v8  ;;  %1014 = vmatpush3.bf16.msra.mxu0 %v1123_v15 }
  0x23   :  { %876 = vmatmul.mubr.f32.vlgmr.msra.gmra.mrb[0].mxu1 %v1135_v21  ;;  %1015 = vmatprep.subr.bf16.mxu0 %v1071_v0 }
  0x24   :  { %996 = vmatpush3.bf16.msra.mxu1 %v995_v4  ;;  %878 = vmatprep.mubr.msk.f32.mxu1 %vm1072_vm1, %v1073_v8 }
  0x25   :  { %948 = vmatmul.mubr.f32.gmra.mrb[2].mxu0 %v1137_v22  ;;  %997 = vmatprep.subr.bf16.mxu1 %v1071_v0 }
  0x26   :  { %950 = vmatprep.mubr.msk.f32.mxu0 %vm1072_vm1, %v1073_v8  ;;  %1017 = vmatpush3.bf16.msra.mxu0 %v1131_v19 }
  0x27   :  { %879 = vmatmul.mubr.f32.gmra.mrb[2].mxu1 %v1137_v22 }
  0x28   :  { %881 = vmatprep.mubr.msk.f32.mxu1 %vm1072_vm1, %v1073_v8  ;;  %999 = vmatpush3.bf16.msra.mxu1 %v998_v5 }
  0x29   :  { %951 = vmatmul.mubr.f32.gmra.mrb[4].mxu0 %v1153_v29 }
  0x2a   :  { %953 = vmatprep.mubr.msk.f32.mxu0 %vm1072_vm1, %v1073_v8 }
  0x2b   :  { %882 = vmatmul.mubr.f32.gmra.mrb[4].mxu1 %v1153_v29 }
  0x2c   :  { %884 = vmatprep.mubr.msk.f32.mxu1 %vm1072_vm1, %v1073_v8 }
  0x2d   :  { %954 = vmatmul.mubr.f32.gmra.mrb[6].mxu0 %v1179_v50 }
  0x2e   :  { %956 = vmatprep.mubr.msk.f32.mxu0 %vm1072_vm1, %v1073_v8 }
  0x2f   :  { %885 = vmatmul.mubr.f32.gmra.mrb[6].mxu1 %v1179_v50 }
  0x30   :  { %887 = vmatprep.mubr.msk.f32.mxu1 %vm1072_vm1, %v1073_v8 }
  0x31   :  { %957 = vmatmul.mubr.f32.gmra.mrb[8].mxu0 %v1187_v55 }
  0x32   :  { %967 = vmatprep.mubr.msk.f32.mxu0 %vm1072_vm1, %v1073_v8 }
  0x33   :  { %888 = vmatmul.mubr.f32.gmra.mrb[8].mxu1 %v1187_v55 }
  0x34   :  { %898 = vmatprep.mubr.msk.f32.mxu1 %vm1072_vm1, %v1073_v8 }
  0x35   :  { %968 = vmatmul.mubr.f32.vlgmr.msra.gmra.mrb[0].mxu0 %v1135_v21 }
  0x36   :  { %970 = vmatprep.mubr.msk.f32.mxu0 %vm1072_vm1, %v1073_v8 }
  0x37   :  { %899 = vmatmul.mubr.f32.vlgmr.msra.gmra.mrb[0].mxu1 %v1148_v27 }
  0x38   :  { %901 = vmatprep.mubr.msk.f32.mxu1 %vm1072_vm1, %v1073_v8 }
  0x39   :  { %971 = vmatmul.mubr.f32.gmra.mrb[2].mxu0 %v1137_v22 }
  0x3a   :  { %973 = vmatprep.mubr.msk.f32.mxu0 %vm1072_vm1, %v1073_v8 }
  0x3b   :  { %902 = vmatmul.mubr.f32.gmra.mrb[2].mxu1 %v1151_v28 }
  0x3c   :  { %904 = vmatprep.mubr.msk.f32.mxu1 %vm1072_vm1, %v1073_v8 }
  0x3d   :  { %974 = vmatmul.mubr.f32.gmra.mrb[4].mxu0 %v1153_v29 }
  0x3e   :  { %976 = vmatprep.mubr.msk.f32.mxu0 %vm1072_vm1, %v1073_v8 }
  0x3f   :  { %905 = vmatmul.mubr.f32.gmra.mrb[4].mxu1 %v1165_v37 }
  0x40   :  { %907 = vmatprep.mubr.msk.f32.mxu1 %vm1072_vm1, %v1073_v8 }
  0x41   :  { %977 = vmatmul.mubr.f32.gmra.mrb[6].mxu0 %v1179_v50 }
  0x42   :  { %979 = vmatprep.mubr.msk.f32.mxu0 %vm1072_vm1, %v1073_v8 }
  0x43   :  { %908 = vmatmul.mubr.f32.gmra.mrb[6].mxu1 %v1185_v53 }
  0x44   :  { %910 = vmatprep.mubr.msk.f32.mxu1 %vm1072_vm1, %v1073_v8  ;;  %v24_v8 = vld [vmem:[%s1303_s1 + $0x8] sm:$0xff] }
  0x45   :  { %980 = vmatmul.mubr.f32.gmra.mrb[8].mxu0 %v1187_v55 }
  0x47   :  { %911 = vmatmul.mubr.f32.gmra.mrb[8].mxu1 %v1195_v60 }
 0x108   :  { %v673_v0 = vpop.f32.mrb[0].mxu0 }
 0x109   :  { %v969_v6 = vpop.f32.mrb[1].mxu0 }
 0x10a   :  { %v354_v7 = vpop.f32.mrb[0].mxu1 }
 0x10b   :  { %v1018_v9 = vadd.f32 1.0, %v354_v7  ;;  %v900_v10 = vpop.f32.mrb[1].mxu1 }
 0x10c   :  { %v679_v11 = vpop.f32.mrb[2].mxu0 }
 0x10d   :  { %v1019_v12 = vadd.f32 %v1018_v9, %v673_v0  ;;  %v972_v13 = vpop.f32.mrb[3].mxu0 }
 0x10e   :  { %v361_v14 = vpop.f32.mrb[2].mxu1 }
 0x10f   :  { %v1020_v15 = vadd.f32 1.0, %v361_v14  ;;  %v903_v16 = vpop.f32.mrb[3].mxu1  ;;  %v701_v22 = vmul.f32 %v1019_v12, %v23_v17 }
 0x110   :  { %v685_v18 = vpop.f32.mrb[4].mxu0 }
 0x111   :  { %v1021_v19 = vadd.f32 %v1020_v15, %v679_v11  ;;  %v975_v20 = vpop.f32.mrb[5].mxu0 }
 0x112   :  { %v368_v21 = vpop.f32.mrb[4].mxu1 }
 0x113   :  { %v702_v23 = vmul.f32 %v1021_v19, %v24_v8  ;;  %v1022_v24 = vadd.f32 1.0, %v368_v21  ;;  %v906_v25 = vpop.f32.mrb[5].mxu1 }
 0x114   :  { %v691_v27 = vpop.f32.mrb[6].mxu0 }
 0x115   :  { %v730_v28 = vadd.f32 %v702_v23, %v701_v22  ;;  %v1023_v29 = vadd.f32 %v1022_v24, %v685_v18  ;;  %v978_v30 = vpop.f32.mrb[7].mxu0 }
 0x116   :  { %v375_v31 = vpop.f32.mrb[6].mxu1 }
 0x117   :  { %v703_v32 = vmul.f32 %v1023_v29, %v25_v26  ;;  %v1024_v33 = vadd.f32 1.0, %v375_v31  ;;  %v909_v34 = vpop.f32.mrb[7].mxu1 }
 0x118   :  { %v697_v36 = vpop.f32.mrb[8].mxu0 }
 0x119   :  { %v731_v37 = vadd.f32 %v730_v28, %v703_v32  ;;  %v1025_v38 = vadd.f32 %v1024_v33, %v691_v27  ;;  %v981_v39 = vpop.f32.mrb[9].mxu0 }
 0x11a   :  { %v382_v40 = vpop.f32.mrb[8].mxu1 }
 0x11b   :  { %v704_v41 = vmul.f32 %v1025_v38, %v26_v35  ;;  %v1026_v42 = vadd.f32 1.0, %v382_v40  ;;  %v912_v43 = vpop.f32.mrb[9].mxu1 }
 0x11d   :  { %v732_v45 = vadd.f32 %v731_v37, %v704_v41  ;;  %v1027_v46 = vadd.f32 %v1026_v42, %v697_v36 }
 0x11f   :  { %v705_v47 = vmul.f32 %v1027_v46, %v27_v44 }
 0x121   :  { %v733_v48 = vadd.f32 %v732_v45, %v705_v47 }
 0x123   :  { %v734_v49 = vrot.slane %v733_v48, 4 }
 0x125   :  { %v735_v50 = vadd.f32 %v734_v49, %v733_v48 }
 0x127   :  { %v736_v51 = vrot.slane %v735_v50, 2 }
 0x129   :  { %v737_v52 = vadd.f32 %v736_v51, %v735_v50 }
 0x12b   :  { %v738_v53 = vrot.slane %v737_v52, 1 }
 0x12d   :  { %v739_v54 = vadd.f32 %v738_v53, %v737_v52 }
 0x12f   :  { %v743_v55 = vmul.f32 0.025, %v739_v54 }
 0x131   :  { %v744_v56 = vsub.f32 %v701_v22, %v743_v55  ;;  %v745_v57 = vsub.f32 %v702_v23, %v743_v55  ;;  %v746_v58 = vsub.f32 %v703_v32, %v743_v55  ;;  %v747_v59 = vsub.f32 %v704_v41, %v743_v55 }
 0x132   :  { %v748_v60 = vsub.f32 %v705_v47, %v743_v55 }
 0x133   :  { %v764_v61 = vmul.f32 %v744_v56, %v744_v56  ;;  %v765_v62 = vmul.f32 %v745_v57, %v745_v57  ;;  %v766_v63 = vmul.f32 %v746_v58, %v746_v58  ;;  %v767_v2 = vmul.f32 %v747_v59, %v747_v59 }
 0x134   :  { %v768_v4 = vmul.f32 %v748_v60, %v748_v60 }
 0x135   :  { %v769_v1 = vadd.f32 %v765_v62, %v764_v61 }
 0x137   :  { %v770_v3 = vadd.f32 %v769_v1, %v766_v63 }
 0x139   :  { %v771_v5 = vadd.f32 %v770_v3, %v767_v2 }
 0x13b   :  { %v772_v0 = vadd.f32 %v771_v5, %v768_v4 }
 0x13d   :  { %v773_v6 = vrot.slane %v772_v0, 4 }
 0x13f   :  { %v774_v7 = vadd.f32 %v773_v6, %v772_v0 }
 0x141   :  { %v775_v9 = vrot.slane %v774_v7, 2 }
 0x143   :  { %v776_v10 = vadd.f32 %v775_v9, %v774_v7 }
 0x145   :  { %v777_v11 = vrot.slane %v776_v10, 1 }
 0x147   :  { %v778_v12 = vadd.f32 %v777_v11, %v776_v10 }
 0x149   :  { %v782_v13 = vsel %vm781_vm2, %v739_v54, %v778_v12 }
 0x14a   :  { %v784_v14 = vsel %vm783_vm3, %v782_v13, 40.0 }
 0x14b   :  { %785 = vst [vmem:[%s1304_s3] sm:$0x7] %v784_v14 }

</bundles_post_ra>
